<compile_context>
chip_gen: v5e
topology: v5e:2x2
jax: 0.10.0
libtpu: 0.0.40
codegen_flags: <defaults>
</compile_context>

<pallas_src>
import functools

import jax
import jax.numpy as jnp
from jax import lax
from jax.experimental import pallas as pl
from jax.experimental.pallas import tpu as pltpu

D = 96    # model width  (from the PyTorch module)
Nh = 2    # attention heads


def _self_attn_kernel(x_ref, wqkv_ref, mask_ref, o_ref, *, nh, dh, d, bt):
    # x_ref   : [bt, D, L]   bt batch elements, PyTorch NCL orientation
    # wqkv_ref: [3D, D]      fused [Wq; Wk; Wv] projection weights ([out, in])
    # mask_ref: [bt, 1, L]   1.0 = valid key, 0.0 = padded key
    # o_ref   : [bt, D, L]
    w_qkv = wqkv_ref[...]                                              # resident

    for b in range(bt):                       # static unroll over the local batch
        x = x_ref[b]                                                   # [D, L]

        # Fused 1x1 convolutions == one MXU matmul, f32 accumulation.
        qkv = jnp.dot(w_qkv, x, preferred_element_type=jnp.float32)   # [3D, L]
        q = qkv[0:d, :] * (dh ** -0.5)                                 # Q scaling
        k = qkv[d:2 * d, :]
        v = qkv[2 * d:3 * d, :]

        # mask_logits: logits + -1e30 * (1 - mask), broadcast over query rows.
        neg = -1e30 * (1.0 - mask_ref[b].astype(jnp.float32))          # [1, L]

        for h in range(nh):                   # Nh == 2, static unroll
            sl = slice(h * dh, (h + 1) * dh)  # sublane slice, 8-aligned (dh = 48)
            qh, kh, vh = q[sl, :], k[sl, :], v[sl, :]                  # [dh, L]

            # logits[lq, lk] = sum_d qh[d, lq] * kh[d, lk]   (MXU)
            logits = lax.dot_general(qh, kh, (((0,), (0,)), ((), ())),
                                     preferred_element_type=jnp.float32)  # [L, L]
            logits = logits + neg                                          # key mask

            # numerically-stable softmax along the key (lane) axis
            m = jnp.max(logits, axis=-1, keepdims=True)
            p = jnp.exp(logits - m)
            inv_l = pl.reciprocal(jnp.sum(p, axis=-1, keepdims=True),
                                  approx=False)                        # exact (EUP)
            wgt = p * inv_l
            # TODO(synk): F.dropout(weights, p=0.5) is training-mode randomness;
            # omitted (eval forward).

            # out_h[d, lq] = sum_lk vh[d, lk] * wgt[lq, lk]   (MXU), NCL oriented.
            out_h = lax.dot_general(vh, wgt, (((1,), (1,)), ((), ())),
                                    preferred_element_type=jnp.float32)  # [dh, L]
            # direct per-head sublane store (no concatenate, lane-dense)
            o_ref[b, sl, :] = out_h.astype(o_ref.dtype)


def self_attention(queries, mask, w_mem, w_query, nh=Nh):
    """queries: [B, D, L] (PyTorch NCL layout)
       mask   : [B, L]    (1 = valid key position, 0 = padding)
       w_mem  : [2D, D, 1] PyTorch Conv1d weight (rows [:D] -> K proj, rows [D:] -> V proj)
       w_query: [D, D, 1]  PyTorch Conv1d weight
       Returns [B, D, L]."""
    B, Dc, L = queries.shape
    dh = Dc // nh

    # Pad the sequence axis to a multiple of 128 (lane-dense loads/stores,
    # clean MXU dims). Zero-extended mask marks padded keys invalid (-1e30).
    Lp = 128 * pl.cdiv(L, 128)
    if Lp != L:
        queries = jnp.pad(queries, ((0, 0), (0, 0), (0, Lp - L)))
        mask = jnp.pad(mask, ((0, 0), (0, Lp - L)))

    # Fuse Q/K/V projection weights into one [3D, D] matrix.
    wq = w_query[:, :, 0]          # [D, D]
    wk = w_mem[:Dc, :, 0]          # [D, D]
    wv = w_mem[Dc:, :, 0]          # [D, D]
    w_qkv = jnp.concatenate([wq, wk, wv], axis=0)          # [3D, D]
    mask3 = mask.reshape(B, 1, Lp).astype(jnp.float32)

    # Batch-block size per grid step: amortize per-step overhead while keeping
    # >= 2 grid steps so the "parallel" axis still splits across TCs (v7x).
    if B >= 2 and B % 2 == 0:
        bt = B // 2
    else:
        bt = 1
    grid = (B // bt,)

    kernel = functools.partial(_self_attn_kernel, nh=nh, dh=dh, d=Dc, bt=bt)

    out = pl.pallas_call(
        kernel,
        out_shape=jax.ShapeDtypeStruct((B, Dc, Lp), queries.dtype),
        grid_spec=pltpu.PrefetchScalarGridSpec(
            num_scalar_prefetch=0,
            grid=grid,
            in_specs=[
                pl.BlockSpec((bt, Dc, Lp), lambda b: (b, 0, 0)),    # activations
                pl.BlockSpec((3 * Dc, Dc), lambda b: (0, 0)),       # fused Wqkv (resident)
                pl.BlockSpec((bt, 1, Lp), lambda b: (b, 0, 0)),     # key mask
            ],
            out_specs=pl.BlockSpec((bt, Dc, Lp), lambda b: (b, 0, 0)),
        ),
        compiler_params=pltpu.CompilerParams(
            dimension_semantics=("parallel",),
            # Explicit VMEM budget; safe on all generations at these shapes.
            # Untiled [L, L] logits means L must stay <~ 1.5k on v7x (64 MiB).
            vmem_limit_bytes=64 * 1024 * 1024,
        ),
    )(queries, w_qkv, mask3)

    if Lp != L:
        out = out[:, :, :L]
    return out


def _reference(queries, mask, w_mem, w_query, nh):
    """Pure-JAX port of the PyTorch SelfAttention.forward (eval mode)."""
    B, Dc, L = queries.shape
    dh = Dc // nh
    mem = jnp.einsum('oc,bcl->bol', w_mem, queries)       # [B, 2D, L]
    qry = jnp.einsum('oc,bcl->bol', w_query, queries)     # [B, D, L]
    mem = jnp.transpose(mem, (0, 2, 1))                   # [B, L, 2D]
    qry = jnp.transpose(qry, (0, 2, 1))                   # [B, L, D]

    def split(t):                                         # [B, L, D] -> [B, nh, L, dh]
        return jnp.transpose(t.reshape(B, L, nh, dh), (0, 2, 1, 3))

    Q = split(qry) * (dh ** -0.5)
    K = split(mem[:, :, :Dc])
    V = split(mem[:, :, Dc:])
    logits = jnp.einsum('bhqd,bhkd->bhqk', Q, K)          # [B, nh, L, L]
    m = mask.astype(jnp.float32).reshape(B, 1, 1, L)
    logits = logits + (-1e30) * (1.0 - m)
    w = jax.nn.softmax(logits, axis=-1)
    out = jnp.einsum('bhqk,bhkd->bhqd', w, V)             # [B, nh, L, dh]
    out = jnp.transpose(out, (0, 2, 1, 3)).reshape(B, L, Dc)
    return jnp.transpose(out, (0, 2, 1))                  # [B, D, L]


if __name__ == "__main__":
    key = jax.random.PRNGKey(0)
    k1, k2, k3 = jax.random.split(key, 3)
    w_mem = jax.random.normal(k2, (2 * D, D, 1), dtype=jnp.float32) * 0.1
    w_query = jax.random.normal(k3, (D, D, 1), dtype=jnp.float32) * 0.1

    # --- case 1: lane-dense sequence length (L % 128 == 0) ---
    B, L = 2, 128
    queries = jax.random.normal(k1, (B, D, L), dtype=jnp.float32)
    lengths = jnp.array([L, L - 28], dtype=jnp.int32)
    mask = (jnp.arange(L)[None, :] < lengths[:, None]).astype(jnp.float32)

    out = jax.block_until_ready(self_attention(queries, mask, w_mem, w_query))
    ref = _reference(queries, mask, w_mem[:, :, 0], w_query[:, :, 0], Nh)
    assert out.shape == ref.shape, (out.shape, ref.shape)
    max_err = float(jnp.max(jnp.abs(out - ref)))
    assert jnp.allclose(out, ref, atol=1e-4, rtol=1e-4), f"case1 mismatch, max_err={max_err}"

    # --- case 2: non-multiple-of-128 length (exercises wrapper padding path) ---
    B2, L2 = 2, 100
    queries2 = jax.random.normal(k1, (B2, D, L2), dtype=jnp.float32)
    lengths2 = jnp.array([L2, L2 - 17], dtype=jnp.int32)
    mask2 = (jnp.arange(L2)[None, :] < lengths2[:, None]).astype(jnp.float32)

    out2 = jax.block_until_ready(self_attention(queries2, mask2, w_mem, w_query))
    ref2 = _reference(queries2, mask2, w_mem[:, :, 0], w_query[:, :, 0], Nh)
    assert out2.shape == ref2.shape, (out2.shape, ref2.shape)
    max_err2 = float(jnp.max(jnp.abs(out2 - ref2)))
    assert jnp.allclose(out2, ref2, atol=1e-4, rtol=1e-4), f"case2 mismatch, max_err={max_err2}"

    print("KERNEL_OK")
</pallas_src>

<mosaic_0001>
module attributes {stable_mosaic.version = 11 : i64} {
  func.func @_self_attn_kernel(%arg0: i32, %arg1: memref<1x96x128xf32, #tpu.memory_space<vmem>>, %arg2: memref<288x96xf32, #tpu.memory_space<vmem>>, %arg3: memref<1x1x128xf32, #tpu.memory_space<vmem>>, %arg4: memref<1x96x128xf32, #tpu.memory_space<vmem>>) attributes {dimension_semantics = [#tpu.dimension_semantics<parallel>], iteration_bounds = array<i64: 2>, scalar_prefetch = 0 : i64, scratch_operands = 0 : i64, tpu.core_type = #tpu.core_type<tc>, window_params = [{transform_indices = @transform_0, window_bounds = array<i64: 1, 96, 128>}, {pipeline_mode = #tpu.pipeline_mode<synchronous>, transform_indices = @transform_1, window_bounds = array<i64: 288, 96>}, {transform_indices = @transform_2, window_bounds = array<i64: 1, 1, 128>}, {transform_indices = @transform_3, window_bounds = array<i64: 1, 96, 128>}]} {
    %c0 = arith.constant 0 : index
    %c0_0 = arith.constant 0 : index
    %0 = vector.load %arg2[%c0, %c0_0] : memref<288x96xf32, #tpu.memory_space<vmem>>, vector<288x96xf32>
    %c0_1 = arith.constant 0 : index
    %c0_2 = arith.constant 0 : index
    %c0_3 = arith.constant 0 : index
    %1 = vector.load %arg1[%c0_1, %c0_2, %c0_3] : memref<1x96x128xf32, #tpu.memory_space<vmem>>, vector<1x96x128xf32>
    %2 = vector.shape_cast %1 : vector<1x96x128xf32> to vector<96x128xf32>
    %cst = arith.constant dense<0.000000e+00> : vector<288x128xf32>
    %3 = tpu.matmul %0, %2, %cst {dimension_numbers = #tpu.dot_dimension_numbers<[1], [0], [0], [1], [0, 0, 1, 1], [], []>} : vector<288x96xf32>, vector<96x128xf32>, vector<288x128xf32> -> vector<288x128xf32>
    %4 = vector.extract_strided_slice %3 {offsets = [0, 0], sizes = [96, 128], strides = [1, 1]} : vector<288x128xf32> to vector<96x128xf32>
    %cst_4 = arith.constant 0.144337565 : f32
    %5 = vector.broadcast %cst_4 : f32 to vector<96x128xf32>
    %6 = arith.mulf %4, %5 : vector<96x128xf32>
    %7 = vector.extract_strided_slice %3 {offsets = [96, 0], sizes = [96, 128], strides = [1, 1]} : vector<288x128xf32> to vector<96x128xf32>
    %8 = vector.extract_strided_slice %3 {offsets = [192, 0], sizes = [96, 128], strides = [1, 1]} : vector<288x128xf32> to vector<96x128xf32>
    %c0_5 = arith.constant 0 : index
    %c0_6 = arith.constant 0 : index
    %c0_7 = arith.constant 0 : index
    %9 = vector.load %arg3[%c0_5, %c0_6, %c0_7] : memref<1x1x128xf32, #tpu.memory_space<vmem>>, vector<1x1x128xf32>
    %10 = vector.shape_cast %9 : vector<1x1x128xf32> to vector<1x128xf32>
    %cst_8 = arith.constant 1.000000e+00 : f32
    %11 = vector.broadcast %cst_8 : f32 to vector<1x128xf32>
    %12 = arith.subf %11, %10 : vector<1x128xf32>
    %cst_9 = arith.constant -1.000000e+30 : f32
    %13 = vector.broadcast %cst_9 : f32 to vector<1x128xf32>
    %14 = arith.mulf %13, %12 : vector<1x128xf32>
    %15 = vector.extract_strided_slice %6 {offsets = [0, 0], sizes = [48, 128], strides = [1, 1]} : vector<96x128xf32> to vector<48x128xf32>
    %16 = vector.extract_strided_slice %7 {offsets = [0, 0], sizes = [48, 128], strides = [1, 1]} : vector<96x128xf32> to vector<48x128xf32>
    %17 = vector.extract_strided_slice %8 {offsets = [0, 0], sizes = [48, 128], strides = [1, 1]} : vector<96x128xf32> to vector<48x128xf32>
    %cst_10 = arith.constant dense<0.000000e+00> : vector<128x128xf32>
    %18 = tpu.matmul %15, %16, %cst_10 {dimension_numbers = #tpu.dot_dimension_numbers<[0], [0], [1], [1], [0, 1, 1, 1], [], []>} : vector<48x128xf32>, vector<48x128xf32>, vector<128x128xf32> -> vector<128x128xf32>
    %19 = vector.broadcast %14 : vector<1x128xf32> to vector<128x128xf32>
    %20 = arith.addf %18, %19 : vector<128x128xf32>
    %cst_11 = arith.constant dense<0xFF800000> : vector<128xf32>
    %21 = vector.multi_reduction <maximumf>, %20, %cst_11 [1] : vector<128x128xf32> to vector<128xf32>
    %22 = vector.shape_cast %21 : vector<128xf32> to vector<128x1xf32>
    %23 = vector.broadcast %22 : vector<128x1xf32> to vector<128x128xf32>
    %24 = arith.subf %20, %23 : vector<128x128xf32>
    %25 = math.exp %24 : vector<128x128xf32>
    %cst_12 = arith.constant dense<0.000000e+00> : vector<128xf32>
    %26 = vector.multi_reduction <add>, %25, %cst_12 [1] : vector<128x128xf32> to vector<128xf32>
    %27 = vector.shape_cast %26 : vector<128xf32> to vector<128x1xf32>
    %28 = tpu.reciprocal %27 : vector<128x1xf32> -> vector<128x1xf32>
    %29 = vector.broadcast %28 : vector<128x1xf32> to vector<128x128xf32>
    %30 = arith.mulf %25, %29 : vector<128x128xf32>
    %cst_13 = arith.constant dense<0.000000e+00> : vector<48x128xf32>
    %31 = tpu.matmul %17, %30, %cst_13 {dimension_numbers = #tpu.dot_dimension_numbers<[1], [1], [0], [0], [0, 0, 1, 0], [], []>} : vector<48x128xf32>, vector<128x128xf32>, vector<48x128xf32> -> vector<48x128xf32>
    %c0_14 = arith.constant 0 : index
    %c0_15 = arith.constant 0 : index
    %c0_16 = arith.constant 0 : index
    %32 = vector.load %arg4[%c0_14, %c0_15, %c0_16] : memref<1x96x128xf32, #tpu.memory_space<vmem>>, vector<1x48x128xf32>
    %33 = vector.shape_cast %32 : vector<1x48x128xf32> to vector<48x128xf32>
    %34 = vector.shape_cast %31 : vector<48x128xf32> to vector<1x48x128xf32>
    tpu.vector_store %arg4[%c0_14, %c0_15, %c0_16], %34 {strides = array<i32>} : memref<1x96x128xf32, #tpu.memory_space<vmem>>, vector<1x48x128xf32>,
    %35 = vector.extract_strided_slice %6 {offsets = [48, 0], sizes = [48, 128], strides = [1, 1]} : vector<96x128xf32> to vector<48x128xf32>
    %36 = vector.extract_strided_slice %7 {offsets = [48, 0], sizes = [48, 128], strides = [1, 1]} : vector<96x128xf32> to vector<48x128xf32>
    %37 = vector.extract_strided_slice %8 {offsets = [48, 0], sizes = [48, 128], strides = [1, 1]} : vector<96x128xf32> to vector<48x128xf32>
    %cst_17 = arith.constant dense<0.000000e+00> : vector<128x128xf32>
    %38 = tpu.matmul %35, %36, %cst_17 {dimension_numbers = #tpu.dot_dimension_numbers<[0], [0], [1], [1], [0, 1, 1, 1], [], []>} : vector<48x128xf32>, vector<48x128xf32>, vector<128x128xf32> -> vector<128x128xf32>
    %39 = vector.broadcast %14 : vector<1x128xf32> to vector<128x128xf32>
    %40 = arith.addf %38, %39 : vector<128x128xf32>
    %cst_18 = arith.constant dense<0xFF800000> : vector<128xf32>
    %41 = vector.multi_reduction <maximumf>, %40, %cst_18 [1] : vector<128x128xf32> to vector<128xf32>
    %42 = vector.shape_cast %41 : vector<128xf32> to vector<128x1xf32>
    %43 = vector.broadcast %42 : vector<128x1xf32> to vector<128x128xf32>
    %44 = arith.subf %40, %43 : vector<128x128xf32>
    %45 = math.exp %44 : vector<128x128xf32>
    %cst_19 = arith.constant dense<0.000000e+00> : vector<128xf32>
    %46 = vector.multi_reduction <add>, %45, %cst_19 [1] : vector<128x128xf32> to vector<128xf32>
    %47 = vector.shape_cast %46 : vector<128xf32> to vector<128x1xf32>
    %48 = tpu.reciprocal %47 : vector<128x1xf32> -> vector<128x1xf32>
    %49 = vector.broadcast %48 : vector<128x1xf32> to vector<128x128xf32>
    %50 = arith.mulf %45, %49 : vector<128x128xf32>
    %cst_20 = arith.constant dense<0.000000e+00> : vector<48x128xf32>
    %51 = tpu.matmul %37, %50, %cst_20 {dimension_numbers = #tpu.dot_dimension_numbers<[1], [1], [0], [0], [0, 0, 1, 0], [], []>} : vector<48x128xf32>, vector<128x128xf32>, vector<48x128xf32> -> vector<48x128xf32>
    %c0_21 = arith.constant 0 : index
    %c48 = arith.constant 48 : index
    %c0_22 = arith.constant 0 : index
    %52 = vector.load %arg4[%c0_21, %c48, %c0_22] : memref<1x96x128xf32, #tpu.memory_space<vmem>>, vector<1x48x128xf32>
    %53 = vector.shape_cast %52 : vector<1x48x128xf32> to vector<48x128xf32>
    %54 = vector.shape_cast %51 : vector<48x128xf32> to vector<1x48x128xf32>
    tpu.vector_store %arg4[%c0_21, %c48, %c0_22], %54 {strides = array<i32>} : memref<1x96x128xf32, #tpu.memory_space<vmem>>, vector<1x48x128xf32>,
    return
  }
  func.func @transform_0(%arg0: i32) -> (i32, i32, i32) {
    %c0_i32 = arith.constant 0 : i32
    %c0_i32_0 = arith.constant 0 : i32
    %c0_i32_1 = arith.constant 0 : i32
    return %arg0, %c0_i32, %c0_i32_0 : i32, i32, i32
  }
  func.func @transform_1(%arg0: i32) -> (i32, i32) {
    %c0_i32 = arith.constant 0 : i32
    %c0_i32_0 = arith.constant 0 : i32
    %c0_i32_1 = arith.constant 0 : i32
    return %c0_i32, %c0_i32_0 : i32, i32
  }
  func.func @transform_2(%arg0: i32) -> (i32, i32, i32) {
    %c0_i32 = arith.constant 0 : i32
    %c0_i32_0 = arith.constant 0 : i32
    %c0_i32_1 = arith.constant 0 : i32
    return %arg0, %c0_i32, %c0_i32_0 : i32, i32, i32
  }
  func.func @transform_3(%arg0: i32) -> (i32, i32, i32) {
    %c0_i32 = arith.constant 0 : i32
    %c0_i32_0 = arith.constant 0 : i32
    %c0_i32_1 = arith.constant 0 : i32
    return %arg0, %c0_i32, %c0_i32_0 : i32, i32, i32
  }
}

</mosaic_0001>

<bundles_post_ra>
// kernel: tpu_custom_call.1
= control target key start
LH: loop header
LB: loop body
LE: loop exit
PB: predicated region body
PF: predicated region fallthrough
CT: control target
= control target key end

     0   :  { %8 = vsyncpa [#allocation3], 0  ;;  %s3361_s0 = inlined_call_operand.hbm [shape: f32[2,96,128], index: 0, kind: input, shape index: {}]   ;;  %s3362_s1 = inlined_call_operand.hbm [shape: f32[288,96], index: 1, kind: input, shape index: {}]   ;;  %s3363_s2 = inlined_call_operand.hbm [shape: f32[2,1,128], index: 2, kind: input, shape index: {}]   ;;  %s3364_s3 = inlined_call_operand.hbm [shape: f32[2,96,128], index: 3, kind: output, shape index: {}]  }
   0x1   :  { %10 = vsyncpa [#allocation3 + $0x1], 0 }
   0x2   :  { %11 = vsyncpa [#allocation6], 0 }
   0x3   :  { %12 = vsyncpa [#allocation4], 0 }
   0x4   :  { %14 = vsyncpa [#allocation4 + $0x1], 0  ;;  %s2230_s12 = smov 0   ;;  %s2232_s13 = smov 0  }
   0x5   :  { %s2234_s14 = smov 0   ;;  %s2236_s15 = smov 0  }
   0x6 LB: > { %s2251_s16 = sadd.s32 1, %s2203_s15   ;;  %s27_s17 = sadd.s32 1, %s2199_s14  ;;  %s2203_s15 = sphi %s2236_s15, %s3452_s15   ;;  %s2199_s14 = sphi %s2234_s14, %s3451_s14   ;;  %s2195_s13 = sphi %s2232_s13, %s3450_s13   ;;  %s2191_s12 = sphi %s2230_s12, %s3449_s12  }
   0x7   : > { %s24_s18 = ssub.s32 %s2203_s15, %s2251_s16  ;;  %p34_p0 = scmp.ne.s32.totalorder %s2199_s14, %s2195_s13 }
   0x8   : > { %p25_p1 = scmp.eq.s32.totalorder %s24_s18, 0  ;;  %p35_p2 = scmp.eq.s32.totalorder %s2203_s15, 0 }
   0x9   : > { %p1870_p5 = scmp.lt.s32.totalorder %s2203_s15, 2  ;;  %s151_s20 = sand.u32 1, %s2203_s15  }
   0xa   : > { %s2260_s19 = scalar_select %p25_p1, %s2199_s14, %s27_s17  }
   0xb   : > { %p36_p3 = por %p35_p2, %p34_p0  ;;  %s153_s21 = sand.u32 1, %s2199_s14  }
   0xc   : > { %s1840_s22 = smul.u32 96, %s153_s21  ;;  %s2279_s4 = scalar_lea.sflag [#allocation3], %s151_s20 }
   0xd   : > { %p2271_p6 = pnand %p1870_p5, %p36_p3  ;;  %s1841_s24 = smul.u32 96, %s2203_s15 }
   0xe   : > { %s155_s28 = scalar_lea.vmem [#allocation2], %s1840_s22  ;;  %s2046_s9 = scalar_lea.hbm %s3361_s0, 192 }
   0xf   : > { %s160_s27 = scalar_lea.hbm %s3361_s0, %s1841_s24  ;;  %s163_s29 = sshll.u32 %s155_s28, 4  ;;  %s164_s29 = int_to_ptr.vmem [resolvable:$true] %s163_s29 }
  0x10   : > { %s161_s30 = sshll.u32 %s160_s27, 4  ;;  %p2043_p8 = pneg %p2271_p6  ;;  %s162_s30 = int_to_ptr.hbm [resolvable:$true] %s161_s30 }
  0x11   : > { %s2039_s5 = sshra.s32 %s162_s30, 4  ;;  %s2040_s5 = int_to_ptr.hbm [resolvable:$true] %s2039_s5 }
  0x12   : > { %s2041_s6 = scalar_lea.hbm %s2040_s5, 96  ;;  %p2047_p11 = scmp.lt.s32.totalorder %s2040_s5, %s3361_s0 }
  0x13   : > { %p2042_p7 = scmp.ne.s32.totalorder %s2040_s5, %s2041_s6  ;;  %p2048_p12 = scmp.lt.s32.totalorder %s2046_s9, %s2041_s6 }
  0x15   : > { %p2044_p9 = pnand %p2043_p8, %p2042_p7  ;;  %p2049_p13 = por %p2048_p12, %p2047_p11 }
  0x17   : > { %p2045_p10 = pneg %p2044_p9 }
  0x19   : > { %p2050_p1 = pnand %p2049_p13, %p2045_p10 }
  0x1b   : > { %2053 = shalt.err (!%p2050_p1)
}
  0x1c   : > { %s2205_s17 = smov 128   ;;  %s2206_s18 = smov 8  }
  0x1d   : > { %1861 = dma.hbm_to_vmem [thread:$0]  (!%p2271_p6), %s162_s30, 1536, %s164_s29, %s2279_s4, %s2205_s17, %s2205_s17, %s2206_s18  }
  0x1e   : > { %s2299_s20 = sadd.s32 4294967295, %s2203_s15   ;;  %s1732_s22 = sadd.s32 4294967294, %s2203_s15  }
  0x1f   : > { %p40_p2 = scmp.ne.s32.totalorder %s2195_s13, %s2191_s12  ;;  %p3365_p3 = scmp.eq.s32.totalorder %s2299_s20, 0 }
  0x20   : > { %p111_p5 = scmp.eq.s32.totalorder %s2299_s20, 1  ;;  %p117_p7 = scmp.eq.s32.totalorder %s1732_s22, 1 }
  0x21   : > { %p2308_p9 = por %p3365_p3, %p40_p2  ;;  %p1733_p10 = scmp.ge.s32.totalorder %s2203_s15, 1 }
  0x22   : > { %p2316_p11 = por %p111_p5, %p34_p0  ;;  %p2320_p12 = por %p117_p7, %p40_p2 }
  0x23   : > { %p124_p13 = scmp.lt.s32.totalorder %s2203_s15, 3  ;;  %s135_s29 = sshll.u32 %s3362_s1, 4  ;;  %s136_s29 = int_to_ptr.hbm [resolvable:$true] %s135_s29 }
  0x24   : > { %s2207_s5 = smov [#allocation5]   ;;  %s179_s9 = scalar_lea.hbm %s3363_s2, %s2203_s15 }
  0x25   : > { %p2328_p1 = pnand %p1733_p10, %p124_p13  ;;  %s137_s6 = sshll.u32 %s2207_s5, 4  ;;  %s138_s6 = int_to_ptr.vmem [resolvable:$true] %s137_s6 }
  0x26   : > { %s176_s10 = scalar_lea.vmem [#allocation7], %s153_s21  ;;  %s181_s22 = sshll.u32 %s179_s9, 4  ;;  %s182_s22 = int_to_ptr.hbm [resolvable:$true] %s181_s22 }
  0x27   : > { %p1854_p0 = pneg %p2328_p1  ;;  %s183_s11 = sshll.u32 %s176_s10, 4  ;;  %s184_s11 = int_to_ptr.vmem [resolvable:$true] %s183_s11 }
  0x28   : > { %s2099_s27 = sshra.s32 %s182_s22, 4  ;;  %s2106_s7 = scalar_lea.hbm %s3363_s2, 2  ;;  %s2100_s27 = int_to_ptr.hbm [resolvable:$true] %s2099_s27 }
  0x29   : > { %p1855_p2 = pnand %p1854_p0, %p3365_p3  ;;  %s2101_s28 = scalar_lea.hbm %s2100_s27, 1 }
  0x2a   : > { %p2102_p5 = scmp.ne.s32.totalorder %s2100_s27, %s2101_s28  ;;  %p2107_p13 = scmp.lt.s32.totalorder %s2100_s27, %s3363_s2 }
  0x2b   : > { %1857 = dma.hbm_to_vmem [thread:$0]  (!%p1855_p2), %s136_s29, 4608, %s138_s6, [#allocation6], %s2205_s17, %s2205_s17, %s2206_s18  }
  0x2c   : > { %p2104_p7 = pnand %p2102_p5, %p2043_p8  ;;  %p2108_p0 = scmp.lt.s32.totalorder %s2106_s7, %s2101_s28 }
  0x2e   : > { %p2105_p10 = pneg %p2104_p7  ;;  %p2109_p4 = por %p2108_p0, %p2107_p13 }
  0x30   : > { %p2110_p3 = pnand %p2109_p4, %p2105_p10 }
  0x32   : > { %2113 = shalt.err (!%p2110_p3)
}
  0x33   : > { %1864 = dma.hbm_to_vmem [thread:$0]  (!%p2271_p6), %s182_s22, 16, %s184_s11, %s2279_s4  }
  0x34   : > { %192 = sbr.rel (%p2328_p1) target bundleno = 1287 (0x507), region = 32 }
  0x39   : > { %s194_s17 = sand.u32 1, %s2299_s20   ;;  %s2361_s18 = sand.u32 1, %s2195_s13  }
  0x3a   : > { %s1842_s29 = smul.u32 96, %s2361_s18  ;;  %s195_s6 = scalar_lea.sflag [#allocation3], %s194_s17 }
  0x3c   : > { %s2366_s10 = scalar_lea.vmem [#allocation2], %s1842_s29 }
  0x3d   : > { %2174 = dma.done.wait (%p2308_p9), %s195_s6, 1536  }
  0x3e   : > { %2176 = vsyncadd (%p2308_p9), %s195_s6, 4294965760  ;;  %p3378_p4 = scmp.eq.s32.totalorder %s2299_s20, 0 }
  0x40   : > { %2178 = dma.done.wait (%p3378_p4), [#allocation6], 4608   ;;  %p3379_p6 = pmov %p3378_p4 }
  0x41   : > { %s212_s23 = scalar_lea.vmem [#allocation7], %s2361_s18 }
  0x42   : > { %2180 = vsyncadd (%p3379_p6), [#allocation6], 4294962688 }
  0x43   : > { %2182 = dma.done.wait (%p2308_p9), %s195_s6, 16  }
  0x44   : > { %2184 = vsyncadd (%p2308_p9), %s195_s6, 4294967280  ;;  %v287_v0 = vld [vmem:[%s2366_s10 + $0x58] sm:$0xff]  ;;  %v286_v1 = vld [vmem:[%s2366_s10 + $0x50] sm:$0xff]  ;;  %vm288_vm0 = vcmask 785408   ;;  %vm572_vm1 = vcmask 392192   ;;  %s3310_s4 = scalar_lea.vmem [#allocation8], %s1842_s29 }
  0x45   : > { %401 = vmatpush.msra.mxu0 %v287_v0  ;;  %1810 = vmatpush.msra.mxu1 %v287_v0  ;;  %v285_v2 = vld [vmem:[%s2366_s10 + $0x48] sm:$0xff]  ;;  %v284_v3 = vld [vmem:[%s2366_s10 + $0x40] sm:$0xff]  ;;  %v283_v4 = vld [vmem:[%s2366_s10 + $0x38] sm:$0xff]  ;;  %s1843_s24 = smul.u32 96, %s2299_s20  ;;  %s1630_s27 = sshll.u32 %s3310_s4, 4  ;;  %s1631_s27 = int_to_ptr.vmem [resolvable:$true] %s1630_s27 }
  0x46   : > { %1811 = vmatpush.msra.mxu3 %v287_v0  ;;  %v282_v5 = vld [vmem:[%s2366_s10 + $0x30] sm:$0xff]  ;;  %v281_v6 = vld [vmem:[%s2366_s10 + $0x28] sm:$0xff]  ;;  %v280_v7 = vld [vmem:[%s2366_s10 + $0x20] sm:$0xff]  ;;  %s1618_s5 = scalar_lea.sflag [#allocation4], %s2361_s18  ;;  %s2149_s9 = scalar_lea.hbm %s3364_s3, 192 }
  0x47   : > { %402 = vmatpush.msra.mxu0 %v286_v1  ;;  %1812 = vmatpush.msra.mxu1 %v286_v1  ;;  %v279_v8 = vld [vmem:[%s2366_s10 + $0x18] sm:$0xff]  ;;  %v278_v9 = vld [vmem:[%s2366_s10 + $0x10] sm:$0xff]  ;;  %v277_v10 = vld [vmem:[%s2366_s10 + $0x8] sm:$0xff]  ;;  %s1629_s22 = scalar_lea.hbm %s3364_s3, %s1843_s24 }
  0x48   : > { %1813 = vmatpush.msra.mxu3 %v286_v1  ;;  %v276_v11 = vld [vmem:[%s2366_s10] sm:$0xff]  ;;  %v241_v13 = vld [vmem:[#allocation5 + $0x8] sm:$0xff]  ;;  %v242_v14 = vld [vmem:[#allocation5 + $0x10] sm:$0xff]  ;;  %s1632_s28 = sshll.u32 %s1629_s22, 4  ;;  %s1633_s28 = int_to_ptr.hbm [resolvable:$true] %s1632_s28 }
  0x49   : > { %403 = vmatpush.msra.mxu0 %v285_v2  ;;  %1814 = vmatpush.msra.mxu1 %v285_v2  ;;  %v240_v12 = vld [vmem:[#allocation5] sm:$0xff]  ;;  %v243_v15 = vld [vmem:[#allocation5 + $0x18] sm:$0xff]  ;;  %v245_v17 = vld [vmem:[#allocation5 + $0x28] sm:$0xff]  ;;  %s2143_s21 = sshra.s32 %s1633_s28, 4  ;;  %s2144_s21 = int_to_ptr.hbm [resolvable:$true] %s2143_s21 }
  0x4a   : > { %1815 = vmatpush.msra.mxu3 %v285_v2  ;;  %v244_v16 = vld [vmem:[#allocation5 + $0x20] sm:$0xff]  ;;  %v246_v18 = vld [vmem:[#allocation5 + $0x30] sm:$0xff]  ;;  %v247_v19 = vld [vmem:[#allocation5 + $0x38] sm:$0xff]  ;;  %s2145_s7 = scalar_lea.hbm %s2144_s21, 96  ;;  %p2150_p1 = scmp.lt.s32.totalorder %s2144_s21, %s3364_s3 }
  0x4b   : > { %404 = vmatpush.msra.mxu0 %v284_v3  ;;  %1816 = vmatpush.msra.mxu1 %v284_v3  ;;  %v248_v20 = vld [vmem:[#allocation5 + $0x40] sm:$0xff]  ;;  %v249_v21 = vld [vmem:[#allocation5 + $0x48] sm:$0xff]  ;;  %v250_v22 = vld [vmem:[#allocation5 + $0x50] sm:$0xff]  ;;  %p2146_p8 = scmp.ne.s32.totalorder %s2144_s21, %s2145_s7  ;;  %p2151_p2 = scmp.lt.s32.totalorder %s2149_s9, %s2145_s7 }
  0x4c   : > { %1817 = vmatpush.msra.mxu3 %v284_v3  ;;  %v251_v23 = vld [vmem:[#allocation5 + $0x58] sm:$0xff]  ;;  %v252_v24 = vld [vmem:[#allocation5 + $0x60] sm:$0xff]  ;;  %v253_v25 = vld [vmem:[#allocation5 + $0x68] sm:$0xff] }
  0x4d   : > { %405 = vmatpush.msra.mxu0 %v283_v4  ;;  %1818 = vmatpush.msra.mxu1 %v283_v4  ;;  %v254_v26 = vld [vmem:[#allocation5 + $0x70] sm:$0xff]  ;;  %v255_v27 = vld [vmem:[#allocation5 + $0x78] sm:$0xff]  ;;  %v256_v29 = vld [vmem:[#allocation5 + $0x80] sm:$0xff]  ;;  %p2147_p3 = pnand %p2146_p8, %p2316_p11  ;;  %p2152_p5 = por %p2151_p2, %p2150_p1 }
  0x4e   : > { %1819 = vmatpush.msra.mxu3 %v283_v4  ;;  %v257_v32 = vld [vmem:[#allocation5 + $0x88] sm:$0xff]  ;;  %v258_v41 = vld [vmem:[#allocation5 + $0x90] sm:$0xff]  ;;  %v259_v45 = vld [vmem:[#allocation5 + $0x98] sm:$0xff] }
  0x4f   : > { %406 = vmatpush.msra.mxu0 %v282_v5  ;;  %1820 = vmatpush.msra.mxu1 %v282_v5  ;;  %v261_v38 = vld [vmem:[#allocation5 + $0xa8] sm:$0xff]  ;;  %v262_v42 = vld [vmem:[#allocation5 + $0xb0] sm:$0xff]  ;;  %v263_v46 = vld [vmem:[#allocation5 + $0xb8] sm:$0xff]  ;;  %p2148_p9 = pneg %p2147_p3 }
  0x50   : > { %1821 = vmatpush.msra.mxu3 %v282_v5  ;;  %v260_v49 = vld [vmem:[#allocation5 + $0xa0] sm:$0xff]  ;;  %v265_v53 = vld [vmem:[#allocation5 + $0xc8] sm:$0xff]  ;;  %v266_v56 = vld [vmem:[#allocation5 + $0xd0] sm:$0xff] }
  0x51   : > { %407 = vmatpush.msra.mxu0 %v281_v6  ;;  %1822 = vmatpush.msra.mxu1 %v281_v6  ;;  %v264_v50 = vld [vmem:[#allocation5 + $0xc0] sm:$0xff]  ;;  %v267_v59 = vld [vmem:[#allocation5 + $0xd8] sm:$0xff]  ;;  %v269_v1 = vld [vmem:[#allocation5 + $0xe8] sm:$0xff]  ;;  %p2153_p7 = pnand %p2152_p5, %p2148_p9 }
  0x52   : > { %1823 = vmatpush.msra.mxu3 %v281_v6  ;;  %v268_v62 = vld [vmem:[#allocation5 + $0xe0] sm:$0xff]  ;;  %v270_v3 = vld [vmem:[#allocation5 + $0xf0] sm:$0xff]  ;;  %v271_v5 = vld [vmem:[#allocation5 + $0xf8] sm:$0xff] }
  0x53   : > { %408 = vmatpush.msra.mxu0 %v280_v7  ;;  %1824 = vmatpush.msra.mxu1 %v280_v7 }
  0x54   : > { %1825 = vmatpush.msra.mxu3 %v280_v7  ;;  %v272_v7 = vld [vmem:[#allocation5 + $0x100] sm:$0xff] }
  0x55   : > { %409 = vmatpush.msra.mxu0 %v279_v8  ;;  %1826 = vmatpush.msra.mxu1 %v279_v8 }
  0x56   : > { %1827 = vmatpush.msra.mxu3 %v279_v8 }
  0x57   : > { %410 = vmatpush.msra.mxu0 %v278_v9  ;;  %1828 = vmatpush.msra.mxu1 %v278_v9 }
  0x58   : > { %1829 = vmatpush.msra.mxu3 %v278_v9  ;;  %v273_v9 = vld [vmem:[#allocation5 + $0x108] sm:$0xff] }
  0x59   : > { %411 = vmatpush.msra.mxu0 %v277_v10  ;;  %1830 = vmatpush.msra.mxu1 %v277_v10 }
  0x5a   : > { %1831 = vmatpush.msra.mxu3 %v277_v10 }
  0x5b   : > { %412 = vmatpush.msra.mxu0 %v276_v11  ;;  %1832 = vmatpush.msra.mxu1 %v276_v11 }
  0x5c   : > { %1739 = vmatmul.msk.f32.vlgmr.msra.gmra.mxu0 %vm288_vm0, %v240_v12  ;;  %1833 = vmatpush.msra.mxu3 %v276_v11 }
  0x5d   : > { %1760 = vmatmul.msk.f32.vlgmr.msra.gmra.mxu1 %vm288_vm0, %v261_v38 }
  0x64   : > { %1740 = vmatmul.msk.f32.gmra.mxu0 %vm288_vm0, %v241_v13 }
  0x65   : > { %1761 = vmatmul.msk.f32.gmra.mxu1 %vm288_vm0, %v262_v42 }
  0x6c   : > { %1741 = vmatmul.msk.f32.gmra.mxu0 %vm288_vm0, %v242_v14 }
  0x6d   : > { %1762 = vmatmul.msk.f32.gmra.mxu1 %vm288_vm0, %v263_v46 }
  0x74   : > { %1742 = vmatmul.msk.f32.gmra.mxu0 %vm288_vm0, %v243_v15 }
  0x75   : > { %1763 = vmatmul.msk.f32.gmra.mxu1 %vm288_vm0, %v264_v50 }
  0x7c   : > { %1743 = vmatmul.msk.f32.gmra.mxu0 %vm288_vm0, %v244_v16  ;;  %v274_v16 = vld [vmem:[#allocation5 + $0x110] sm:$0xff] }
  0x7d   : > { %1764 = vmatmul.msk.f32.gmra.mxu1 %vm288_vm0, %v265_v53  ;;  %1773 = vmatmul.msk.f32.vlgmr.msra.gmra.mxu3 %vm288_vm0, %v274_v16 }
  0x84   : > { %1744 = vmatmul.msk.f32.gmra.mxu0 %vm288_vm0, %v245_v17 }
  0x85   : > { %1765 = vmatmul.msk.f32.gmra.mxu1 %vm288_vm0, %v266_v56 }
  0x8c   : > { %1745 = vmatmul.msk.f32.gmra.mxu0 %vm288_vm0, %v246_v18 }
  0x8d   : > { %1766 = vmatmul.msk.f32.gmra.mxu1 %vm288_vm0, %v267_v59 }
  0x94   : > { %1746 = vmatmul.msk.f32.gmra.mxu0 %vm288_vm0, %v247_v19 }
  0x95   : > { %1767 = vmatmul.msk.f32.gmra.mxu1 %vm288_vm0, %v268_v62 }
  0x9c   : > { %1747 = vmatmul.msk.f32.gmra.mxu0 %vm288_vm0, %v248_v20  ;;  %v275_v20 = vld [vmem:[#allocation5 + $0x118] sm:$0xff] }
  0x9d   : > { %1768 = vmatmul.msk.f32.gmra.mxu1 %vm288_vm0, %v269_v1  ;;  %1774 = vmatmul.msk.f32.gmra.mxu3 %vm288_vm0, %v275_v20 }
  0xa4   : > { %1748 = vmatmul.msk.f32.gmra.mxu0 %vm288_vm0, %v249_v21 }
  0xa5   : > { %1769 = vmatmul.msk.f32.gmra.mxu1 %vm288_vm0, %v270_v3 }
  0xac   : > { %1749 = vmatmul.msk.f32.gmra.mxu0 %vm288_vm0, %v250_v22 }
  0xad   : > { %1770 = vmatmul.msk.f32.gmra.mxu1 %vm288_vm0, %v271_v5 }
  0xb4   : > { %1750 = vmatmul.msk.f32.gmra.mxu0 %vm288_vm0, %v251_v23 }
  0xb5   : > { %1771 = vmatmul.msk.f32.gmra.mxu1 %vm288_vm0, %v272_v7 }
  0xbc   : > { %1751 = vmatmul.msk.f32.gmra.mxu0 %vm288_vm0, %v252_v24 }
  0xbd   : > { %1772 = vmatmul.msk.f32.gmra.mxu1 %vm288_vm0, %v273_v9 }
  0xc4   : > { %1752 = vmatmul.msk.f32.gmra.mxu0 %vm288_vm0, %v253_v25 }
  0xcc   : > { %1753 = vmatmul.msk.f32.gmra.mxu0 %vm288_vm0, %v254_v26 }
  0xd4   : > { %1754 = vmatmul.msk.f32.gmra.mxu0 %vm288_vm0, %v255_v27 }
  0xd9   : > { %v414_v28 = vpop.f32.mrf.mxu0 }
  0xda   : > { %v522_v30 = vmul.f32 0.14433756, %v414_v28  ;;  %v477_v12 = vpop.f32.mrf.mxu1 }
  0xdc   : > { %1755 = vmatmul.msk.f32.gmra.mxu0 %vm288_vm0, %v256_v29  ;;  %540 = vxpose.xlu0.b32.start [1/6] (short) %v522_v30, 128 }
  0xe1   : > { %v417_v31 = vpop.f32.mrf.mxu0 }
  0xe2   : > { %v523_v33 = vmul.f32 0.14433756, %v417_v31  ;;  %v480_v14 = vpop.f32.mrf.mxu1 }
  0xe4   : > { %1756 = vmatmul.msk.f32.gmra.mxu0 %vm288_vm0, %v257_v32  ;;  %541 = vxpose.xlu0.b32.cont [2/6] (short) %v523_v33, 128 }
  0xe9   : > { %v420_v34 = vpop.f32.mrf.mxu0 }
  0xea   : > { %v524_v35 = vmul.f32 0.14433756, %v420_v34  ;;  %v483_v18 = vpop.f32.mrf.mxu1 }
  0xeb   : > { %1169 = vmatpush.msrb.mxu3 %v483_v18 }
  0xec   : > { %542 = vxpose.xlu0.b32.cont [3/6] (short) %v524_v35, 128  ;;  %1757 = vmatmul.msk.f32.gmra.mxu0 %vm288_vm0, %v258_v41 }
  0xed   : > { %1170 = vmatpush.msrb.mxu3 %v480_v14 }
  0xef   : > { %1171 = vmatpush.msrb.mxu3 %v477_v12 }
  0xf1   : > { %v423_v36 = vpop.f32.mrf.mxu0 }
  0xf2   : > { %v525_v37 = vmul.f32 0.14433756, %v423_v36  ;;  %v2433_v24 = vpop.f32.mrf.mxu1 }
  0xf4   : > { %543 = vxpose.xlu0.b32.cont [4/6] (short) %v525_v37, 128  ;;  %1758 = vmatmul.msk.f32.gmra.mxu0 %vm288_vm0, %v259_v45 }
  0xf9   : > { %v426_v39 = vpop.f32.mrf.mxu0 }
  0xfa   : > { %v526_v40 = vmul.f32 0.14433756, %v426_v39  ;;  %v2436_v26 = vpop.f32.mrf.mxu1 }
  0xfc   : > { %544 = vxpose.xlu0.b32.cont [5/6] (short) %v526_v40, 128  ;;  %1759 = vmatmul.msk.f32.gmra.mxu0 %vm288_vm0, %v260_v49 }
 0x101   : > { %v429_v43 = vpop.f32.mrf.mxu0 }
 0x102   : > { %v527_v44 = vmul.f32 0.14433756, %v429_v43  ;;  %v2439_v28 = vpop.f32.mrf.mxu1 }
 0x104   : > { %545 = vxpose.xlu0.b32.end [6/6] (short) %v527_v44, 128 }
 0x109   : > { %v432_v47 = vpop.f32.mrf.mxu0 }
 0x10a   : > { %v528_v48 = vmul.f32 0.14433756, %v432_v47  ;;  %v2443_v31 = vpop.f32.mrf.mxu1 }
 0x10c   : > { %1079 = vxpose.xlu1.b32.start [1/6] (short) %v528_v48, 128 }
 0x111   : > { %v435_v51 = vpop.f32.mrf.mxu0 }
 0x112   : > { %v529_v52 = vmul.f32 0.14433756, %v435_v51  ;;  %v2449_v36 = vpop.f32.mrf.mxu1 }
 0x113   : > { %3380 = vst [vmem:[#allocation13_spill] sm:$0xff] %v2449_v36 }
 0x114   : > { %1080 = vxpose.xlu1.b32.cont [2/6] (short) %v529_v52, 128 }
 0x119   : > { %v438_v54 = vpop.f32.mrf.mxu0 }
 0x11a   : > { %v530_v55 = vmul.f32 0.14433756, %v438_v54  ;;  %v2453_v39 = vpop.f32.mrf.mxu1 }
 0x11b   : > { %3381 = vst [vmem:[#allocation14_spill] sm:$0xff] %v2453_v39 }
 0x11c   : > { %1081 = vxpose.xlu1.b32.cont [3/6] (short) %v530_v55, 128 }
 0x121   : > { %v441_v57 = vpop.f32.mrf.mxu0 }
 0x122   : > { %v531_v58 = vmul.f32 0.14433756, %v441_v57  ;;  %v2457_v42 = vpop.f32.mrf.mxu1 }
 0x123   : > { %3382 = vst [vmem:[#allocation15_spill] sm:$0xff] %v2457_v42 }
 0x124   : > { %1082 = vxpose.xlu1.b32.cont [4/6] (short) %v531_v58, 128  ;;  %v534_v58 = vld [vmem:[%s212_s23] sm:$0x1] }
 0x125   : > { %v535_v59 = vsub.f32 1.0, %v534_v58 }
 0x129   : > { %v444_v60 = vpop.f32.mrf.mxu0 }
 0x12a   : > { %v532_v61 = vmul.f32 0.14433756, %v444_v60  ;;  %v2461_v45 = vpop.f32.mrf.mxu1 }
 0x12b   : > { %3383 = vst [vmem:[#allocation16_spill] sm:$0xff] %v2461_v45 }
 0x12c   : > { %1083 = vxpose.xlu1.b32.cont [5/6] (short) %v532_v61, 128  ;;  %v536_v61 = vmul.f32 -1e+30, %v535_v59 }
 0x131   : > { %v447_v63 = vpop.f32.mrf.mxu0 }
 0x132   : > { %v533_v0 = vmul.f32 0.14433756, %v447_v63  ;;  %v2467_v50 = vpop.f32.mrf.mxu1  ;;  %v2479_v63 = vperm.slane %v536_v61, 0 }
 0x133   : > { %3384 = vst [vmem:[#allocation17_spill] sm:$0xff] %v2467_v50 }
 0x134   : > { %1084 = vxpose.xlu1.b32.end [6/6] (short) %v533_v0, 128 }
 0x139   : > { %v450_v2 = vpop.f32.mrf.mxu0 }
 0x13a   : > { %v2471_v53 = vpop.f32.mrf.mxu1 }
 0x13b   : > { %3385 = vst [vmem:[#allocation18_spill] sm:$0xff] %v2471_v53 }
 0x141   : > { %v453_v4 = vpop.f32.mrf.mxu0 }
 0x149   : > { %v456_v6 = vpop.f32.mrf.mxu0 }
 0x151   : > { %v459_v8 = vpop.f32.mrf.mxu0 }
 0x159   : > { %v462_v10 = vpop.f32.mrf.mxu0 }
 0x161   : > { %v465_v11 = vpop.f32.mrf.mxu0 }
 0x162   : > { %631 = vmatpush.msrb.mxu1 %v465_v11  ;;  %1834 = vmatpush.msra.mxu2 %v465_v11 }
 0x164   : > { %632 = vmatpush.msrb.mxu1 %v462_v10  ;;  %1835 = vmatpush.msra.mxu2 %v462_v10 }
 0x166   : > { %633 = vmatpush.msrb.mxu1 %v459_v8  ;;  %1836 = vmatpush.msra.mxu2 %v459_v8 }
 0x168   : > { %634 = vmatpush.msrb.mxu1 %v456_v6  ;;  %1837 = vmatpush.msra.mxu2 %v456_v6  ;;  %v2494_v6 = vpop.f32.mrf.mxu3 }
 0x169   : > { %v468_v13 = vpop.f32.mrf.mxu0  ;;  %3386 = vst [vmem:[#allocation19_spill] sm:$0xff] %v2494_v6 }
 0x16a   : > { %635 = vmatpush.msrb.mxu1 %v453_v4  ;;  %1838 = vmatpush.msra.mxu2 %v453_v4 }
 0x16c   : > { %636 = vmatpush.msrb.mxu1 %v450_v2  ;;  %1839 = vmatpush.msra.mxu2 %v450_v2 }
 0x170   : > { %v2502_v10 = vpop.f32.mrf.mxu3 }
 0x171   : > { %v471_v17 = vpop.f32.mrf.mxu0  ;;  %3387 = vst [vmem:[#allocation20_spill] sm:$0xff] %v2502_v10 }
 0x179   : > { %v474_v21 = vpop.f32.mrf.mxu0 }
 0x17a   : > { %1172 = vmatpush.msrb.mxu3 %v474_v21 }
 0x17c   : > { %1173 = vmatpush.msrb.mxu3 %v471_v17 }
 0x17e   : > { %1174 = vmatpush.msrb.mxu3 %v468_v13 }
 0x180   : > { %v556_v15 = vpop.trf.xlu0 }
 0x181   : > { %1775 = vmatmul.msk.f32.vlgmr.msrb.gmra.mxu1 %vm572_vm1, %v556_v15 }
 0x188   : > { %v557_v19 = vpop.trf.xlu0 }
 0x189   : > { %1776 = vmatmul.msk.f32.gmra.mxu1 %vm572_vm1, %v557_v19 }
 0x190   : > { %v558_v22 = vpop.trf.xlu0 }
 0x191   : > { %1777 = vmatmul.msk.f32.gmra.mxu1 %vm572_vm1, %v558_v22 }
 0x198   : > { %v559_v23 = vpop.trf.xlu0 }
 0x199   : > { %1778 = vmatmul.msk.f32.gmra.mxu1 %vm572_vm1, %v559_v23 }
 0x1a0   : > { %v560_v25 = vpop.trf.xlu0 }
 0x1a1   : > { %1779 = vmatmul.msk.f32.gmra.mxu1 %vm572_vm1, %v560_v25 }
 0x1a8   : > { %v561_v27 = vpop.trf.xlu0 }
 0x1a9   : > { %1780 = vmatmul.msk.f32.gmra.mxu1 %vm572_vm1, %v561_v27 }
 0x1b0   : > { %v562_v29 = vpop.trf.xlu0  ;;  %v1095_v30 = vpop.trf.xlu1 }
 0x1b1   : > { %1791 = vmatmul.msk.f32.vlgmr.msrb.gmra.mxu3 %vm572_vm1, %v1095_v30  ;;  %1781 = vmatmul.msk.f32.gmra.mxu1 %vm572_vm1, %v562_v29 }
 0x1b8   : > { %v563_v32 = vpop.trf.xlu0  ;;  %v1096_v33 = vpop.trf.xlu1 }
 0x1b9   : > { %1792 = vmatmul.msk.f32.gmra.mxu3 %vm572_vm1, %v1096_v33  ;;  %1782 = vmatmul.msk.f32.gmra.mxu1 %vm572_vm1, %v563_v32 }
 0x1c0   : > { %v564_v34 = vpop.trf.xlu0  ;;  %v1097_v35 = vpop.trf.xlu1 }
 0x1c1   : > { %1783 = vmatmul.msk.f32.vlgmr.msra.gmra.mxu2 %vm572_vm1, %v564_v34  ;;  %1793 = vmatmul.msk.f32.gmra.mxu3 %vm572_vm1, %v1097_v35 }
 0x1c8   : > { %v565_v37 = vpop.trf.xlu0  ;;  %v1098_v38 = vpop.trf.xlu1 }
 0x1c9   : > { %1784 = vmatmul.msk.f32.gmra.mxu2 %vm572_vm1, %v565_v37  ;;  %1794 = vmatmul.msk.f32.gmra.mxu3 %vm572_vm1, %v1098_v38 }
 0x1d0   : > { %v566_v40 = vpop.trf.xlu0  ;;  %v1099_v41 = vpop.trf.xlu1 }
 0x1d1   : > { %1785 = vmatmul.msk.f32.gmra.mxu2 %vm572_vm1, %v566_v40  ;;  %1795 = vmatmul.msk.f32.gmra.mxu3 %vm572_vm1, %v1099_v41 }
 0x1d8   : > { %v1100_v43 = vpop.trf.xlu1  ;;  %v567_v44 = vpop.trf.xlu0 }
 0x1d9   : > { %1796 = vmatmul.msk.f32.gmra.mxu3 %vm572_vm1, %v1100_v43  ;;  %1786 = vmatmul.msk.f32.gmra.mxu2 %vm572_vm1, %v567_v44 }
 0x1e0   : > { %v1101_v46 = vpop.trf.xlu1  ;;  %v568_v47 = vpop.trf.xlu0 }
 0x1e1   : > { %1797 = vmatmul.msk.f32.gmra.mxu3 %vm572_vm1, %v1101_v46  ;;  %1787 = vmatmul.msk.f32.gmra.mxu2 %vm572_vm1, %v568_v47 }
 0x1e8   : > { %v1102_v48 = vpop.trf.xlu1  ;;  %v569_v49 = vpop.trf.xlu0 }
 0x1e9   : > { %1798 = vmatmul.msk.f32.gmra.mxu3 %vm572_vm1, %v1102_v48  ;;  %1788 = vmatmul.msk.f32.gmra.mxu2 %vm572_vm1, %v569_v49 }
 0x1f0   : > { %v1103_v51 = vpop.trf.xlu1  ;;  %v570_v52 = vpop.trf.xlu0 }
 0x1f1   : > { %1799 = vmatmul.msk.f32.gmra.mxu3 %vm572_vm1, %v1103_v51  ;;  %1789 = vmatmul.msk.f32.gmra.mxu2 %vm572_vm1, %v570_v52 }
 0x1f8   : > { %v571_v54 = vpop.trf.xlu0  ;;  %v1104_v55 = vpop.trf.xlu1 }
 0x1f9   : > { %1790 = vmatmul.msk.f32.gmra.mxu2 %vm572_vm1, %v571_v54  ;;  %1800 = vmatmul.msk.f32.gmra.mxu3 %vm572_vm1, %v1104_v55 }
 0x1fe   : > { %v638_v56 = vpop.f32.mrf.mxu1 }
 0x1ff   : > { %v2492_v5 = vadd.f32 %v638_v56, %v2479_v63 }
 0x200   : > { %v1105_v57 = vpop.trf.xlu1 }
 0x201   : > { %1801 = vmatmul.msk.f32.gmra.mxu3 %vm572_vm1, %v1105_v57 }
 0x206   : > { %v641_v60 = vpop.f32.mrf.mxu1 }
 0x207   : > { %v2487_v3 = vadd.f32 %v641_v60, %v2479_v63 }
 0x208   : > { %v1106_v62 = vpop.trf.xlu1 }
 0x209   : > { %1802 = vmatmul.msk.f32.gmra.mxu3 %vm572_vm1, %v1106_v62 }
 0x20e   : > { %v644_v0 = vpop.f32.mrf.mxu1 }
 0x20f   : > { %v2482_v1 = vadd.f32 %v644_v0, %v2479_v63 }
 0x210   : > { %v1107_v2 = vpop.trf.xlu1 }
 0x211   : > { %690 = vmax.xlane.f32.xlu2 %v2482_v1  ;;  %1803 = vmatmul.msk.f32.gmra.mxu3 %vm572_vm1, %v1107_v2 }
 0x216   : > { %v647_v7 = vpop.f32.mrf.mxu1 }
 0x217   : > { %v2498_v8 = vadd.f32 %v647_v7, %v2479_v63 }
 0x218   : > { %v1108_v4 = vpop.trf.xlu1 }
 0x219   : > { %688 = vmax.xlane.f32.xlu2 %v2487_v3  ;;  %1804 = vmatmul.msk.f32.gmra.mxu3 %vm572_vm1, %v1108_v4 }
 0x21e   : > { %v650_v23 = vpop.f32.mrf.mxu1 }
 0x21f   : > { %v2528_v27 = vadd.f32 %v650_v23, %v2479_v63 }
 0x220   : > { %v1109_v9 = vpop.trf.xlu1 }
 0x221   : > { %686 = vmax.xlane.f32.xlu2 %v2492_v5  ;;  %1805 = vmatmul.msk.f32.gmra.mxu3 %vm572_vm1, %v1109_v9 }
 0x226   : > { %v653_v34 = vpop.f32.mrf.mxu1 }
 0x227   : > { %v2540_v37 = vadd.f32 %v653_v34, %v2479_v63 }
 0x228   : > { %v1110_v11 = vpop.trf.xlu1 }
 0x229   : > { %692 = vmax.xlane.f32.xlu2 %v2498_v8  ;;  %1806 = vmatmul.msk.f32.gmra.mxu3 %vm572_vm1, %v1110_v11 }
 0x22e   : > { %v656_v44 = vpop.f32.mrf.mxu1 }
 0x22f   : > { %v2555_v47 = vadd.f32 %v656_v44, %v2479_v63 }
 0x234   : > { %v2505_v12 = vpop.f32.mrf.mxu3 }
 0x236   : > { %v659_v52 = vpop.f32.mrf.mxu1 }
 0x237   : > { %v2568_v54 = vadd.f32 %v659_v52, %v2479_v63 }
 0x23c   : > { %v2507_v13 = vpop.f32.mrf.mxu3 }
 0x244   : > { %v662_v14 = vpop.f32.mrf.mxu2  ;;  %v2509_v15 = vpop.f32.mrf.mxu3 }
 0x245   : > { %v2512_v16 = vadd.f32 %v662_v14, %v2479_v63 }
 0x247   : > { %702 = vmax.xlane.f32.xlu1 %v2512_v16 }
 0x24c   : > { %v665_v17 = vpop.f32.mrf.mxu2  ;;  %v2515_v18 = vpop.f32.mrf.mxu3 }
 0x24d   : > { %v2518_v19 = vadd.f32 %v665_v17, %v2479_v63 }
 0x24f   : > { %704 = vmax.xlane.f32.xlu0 %v2518_v19 }
 0x254   : > { %v668_v20 = vpop.f32.mrf.mxu2  ;;  %v2521_v21 = vpop.f32.mrf.mxu3 }
 0x255   : > { %v2524_v22 = vadd.f32 %v668_v20, %v2479_v63 }
 0x257   : > { %706 = vmax.xlane.f32.xlu2 %v2524_v22 }
 0x25c   : > { %v1191_v25 = vpop.f32.mrf.mxu3  ;;  %v671_v30 = vpop.f32.mrf.mxu2 }
 0x25d   : > { %v2531_v29 = vadd.f32 %v1191_v25, %v2479_v63  ;;  %v2536_v32 = vadd.f32 %v671_v30, %v2479_v63 }
 0x25f   : > { %694 = vmax.xlane.f32.xlu2 %v2528_v27  ;;  %1234 = vmax.xlane.f32.xlu0 %v2531_v29 }
 0x264   : > { %v1194_v33 = vpop.f32.mrf.mxu3  ;;  %v674_v38 = vpop.f32.mrf.mxu2 }
 0x265   : > { %v2544_v40 = vadd.f32 %v674_v38, %v2479_v63  ;;  %v2560_v49 = vadd.f32 %v1194_v33, %v2479_v63 }
 0x267   : > { %708 = vmax.xlane.f32.xlu2 %v2536_v32 }
 0x26c   : > { %v1197_v35 = vpop.f32.mrf.mxu3  ;;  %v677_v48 = vpop.f32.mrf.mxu2 }
 0x26d   : > { %v2552_v46 = vadd.f32 %v1197_v35, %v2479_v63  ;;  %v2563_v51 = vadd.f32 %v677_v48, %v2479_v63 }
 0x26f   : > { %696 = vmax.xlane.f32.xlu2 %v2540_v37 }
 0x274   : > { %v1200_v41 = vpop.f32.mrf.mxu3  ;;  %v680_v55 = vpop.f32.mrf.mxu2 }
 0x275   : > { %v2547_v43 = vadd.f32 %v1200_v41, %v2479_v63  ;;  %v2572_v56 = vadd.f32 %v680_v55, %v2479_v63 }
 0x277   : > { %710 = vmax.xlane.f32.xlu2 %v2544_v40  ;;  %1240 = vmax.xlane.f32.xlu1 %v2547_v43 }
 0x27c   : > { %v1203_v57 = vpop.f32.mrf.mxu3  ;;  %v683_v58 = vpop.f32.mrf.mxu2 }
 0x27d   : > { %v2576_v59 = vadd.f32 %v683_v58, %v2479_v63  ;;  %v2580_v61 = vadd.f32 %v1203_v57, %v2479_v63 }
 0x27f   : > { %698 = vmax.xlane.f32.xlu2 %v2555_v47  ;;  %1238 = vmax.xlane.f32.xlu1 %v2552_v46 }
 0x284   : > { %v1206_v60 = vpop.f32.mrf.mxu3  ;;  %v2582_v62 = vpop.xlane.xlu2 %690 }
 0x285   : > { %v2586_v2 = vadd.f32 %v1206_v60, %v2479_v63 }
 0x287   : > { %712 = vmax.xlane.f32.xlu2 %v2563_v51  ;;  %1236 = vmax.xlane.f32.xlu1 %v2560_v49 }
 0x28c   : > { %v1209_v0 = vpop.f32.mrf.mxu3  ;;  %v2588_v4 = vpop.xlane.xlu2 %688 }
 0x28d   : > { %v2592_v9 = vadd.f32 %v1209_v0, %v2479_v63 }
 0x28f   : > { %700 = vmax.xlane.f32.xlu2 %v2568_v54 }
 0x294   : > { %v1212_v7 = vpop.f32.mrf.mxu3  ;;  %v2595_v11 = vpop.xlane.xlu2 %686 }
 0x295   : > { %v2598_v14 = vadd.f32 %v1212_v7, %v2479_v63 }
 0x297   : > { %714 = vmax.xlane.f32.xlu2 %v2572_v56 }
 0x29c   : > { %v1215_v17 = vpop.f32.mrf.mxu3  ;;  %v2601_v20 = vpop.xlane.xlu2 %692 }
 0x29d   : > { %v2604_v23 = vadd.f32 %v1215_v17, %v2479_v63 }
 0x29f   : > { %716 = vmax.xlane.f32.xlu2 %v2576_v59 }
 0x2a4   : > { %v1218_v25 = vpop.f32.mrf.mxu3 }
 0x2a5   : > { %v2608_v33 = vadd.f32 %v1218_v25, %v2479_v63 }
 0x2a7   : > { %1242 = vmax.xlane.f32.xlu2 %v2580_v61 }
 0x2ac   : > { %v1221_v38 = vpop.f32.mrf.mxu3 }
 0x2ad   : > { %v2614_v48 = vadd.f32 %v1221_v38, %v2479_v63 }
 0x2af   : > { %1244 = vmax.xlane.f32.xlu2 %v2586_v2 }
 0x2b7   : > { %1246 = vmax.xlane.f32.xlu2 %v2592_v9 }
 0x2bf   : > { %1248 = vmax.xlane.f32.xlu2 %v2598_v14 }
 0x2c2   : > { %v705_v34 = vpop.xlane.xlu0 %704 }
 0x2c3   : > { %v727_v35 = vsub.f32 %v2518_v19, %v705_v34 }
 0x2c5   : > { %v752_v52 = vmul.f32 1.442695, %v727_v35 }
 0x2c7   : > { %1250 = vmax.xlane.f32.xlu2 %v2604_v23 }
 0x2ca   : > { %v707_v30 = vpop.xlane.xlu2 %706 }
 0x2cb   : > { %v728_v57 = vsub.f32 %v2524_v22, %v707_v30 }
 0x2cd   : > { %v754_v60 = vmul.f32 1.442695, %v728_v57  ;;  %v2647_v57 = vadd.f32 %v2509_v15, %v2479_v63  ;;  %v2661_v15 = vadd.f32 %v2505_v12, %v2479_v63 }
 0x2cf   : > { %1252 = vmax.xlane.f32.xlu2 %v2608_v33 }
 0x2d2   : > { %v695_v41 = vpop.xlane.xlu2 %694 }
 0x2d3   : > { %v722_v44 = vsub.f32 %v2528_v27, %v695_v41 }
 0x2d5   : > { %v742_v55 = vmul.f32 1.442695, %v722_v44 }
 0x2d7   : > { %1911 = vpow2.f32 %v742_v55  ;;  %1254 = vmax.xlane.f32.xlu2 %v2614_v48 }
 0x2d8   : > { %1913 = vpow2.f32 %v752_v52 }
 0x2d9   : > { %1915 = vpow2.f32 %v754_v60 }
 0x2da   : > { %v709_v58 = vpop.xlane.xlu2 %708 }
 0x2db   : > { %v729_v27 = vsub.f32 %v2536_v32, %v709_v58 }
 0x2dd   : > { %v2618_v0 = vpop.eup %1911  ;;  %v756_v25 = vmul.f32 1.442695, %v729_v27 }
 0x2de   : > { %v2620_v19 = vpop.eup %1913  ;;  %774 = vadd.xlane.f32.xlu0 %v2618_v0 }
 0x2df   : > { %784 = vadd.xlane.f32.xlu2 %v2620_v19  ;;  %v2626_v35 = vpop.eup %1915 }
 0x2e2   : > { %v697_v7 = vpop.xlane.xlu2 %696 }
 0x2e3   : > { %v723_v17 = vsub.f32 %v2540_v37, %v697_v7  ;;  %v2638_v37 = vadd.f32 %v2515_v18, %v2479_v63  ;;  %v2652_v18 = vadd.f32 %v2507_v13, %v2479_v63 }
 0x2e5   : > { %v744_v34 = vmul.f32 1.442695, %v723_v17 }
 0x2e7   : > { %1917 = vpow2.f32 %v744_v34  ;;  %786 = vadd.xlane.f32.xlu2 %v2626_v35  ;;  %v703_v34 = vpop.xlane.xlu1 %702 }
 0x2e8   : > { %1919 = vpow2.f32 %v756_v25 }
 0x2ea   : > { %v711_v22 = vpop.xlane.xlu2 %710 }
 0x2eb   : > { %v730_v30 = vsub.f32 %v2544_v40, %v711_v22 }
 0x2ed   : > { %v2630_v38 = vpop.eup %1917  ;;  %v758_v41 = vmul.f32 1.442695, %v730_v30 }
 0x2ee   : > { %v2632_v44 = vpop.eup %1919  ;;  %776 = vadd.xlane.f32.xlu1 %v2630_v38 }
 0x2ef   : > { %1921 = vpow2.f32 %v758_v41  ;;  %788 = vadd.xlane.f32.xlu2 %v2632_v44  ;;  %v726_v41 = vsub.f32 %v2512_v16, %v703_v34 }
 0x2f1   : > { %v750_v12 = vmul.f32 1.442695, %v726_v41 }
 0x2f2   : > { %v699_v32 = vpop.xlane.xlu2 %698 }
 0x2f5   : > { %v2640_v52 = vpop.eup %1921 }
 0x2f6   : > { %1230 = vmax.xlane.f32.xlu1 %v2638_v37 }
 0x2f7   : > { %790 = vadd.xlane.f32.xlu2 %v2640_v52 }
 0x2fa   : > { %v713_v40 = vpop.xlane.xlu2 %712 }
 0x2fb   : > { %v731_v55 = vsub.f32 %v2563_v51, %v713_v40 }
 0x2fd   : > { %v760_v58 = vmul.f32 1.442695, %v731_v55 }
 0x2fe   : > { %1228 = vmax.xlane.f32.xlu1 %v2647_v57 }
 0x2ff   : > { %1923 = vpow2.f32 %v760_v58 }
 0x302   : > { %v701_v60 = vpop.xlane.xlu2 %700 }
 0x303   : > { %v725_v55 = vsub.f32 %v2568_v54, %v701_v60 }
 0x305   : > { %v2654_v27 = vpop.eup %1923  ;;  %v748_v58 = vmul.f32 1.442695, %v725_v55 }
 0x306   : > { %792 = vadd.xlane.f32.xlu2 %v2654_v27  ;;  %1226 = vmax.xlane.f32.xlu1 %v2652_v18 }
 0x30a   : > { %v715_v51 = vpop.xlane.xlu2 %714 }
 0x30b   : > { %v732_v7 = vsub.f32 %v2572_v56, %v715_v51 }
 0x30d   : > { %v762_v17 = vmul.f32 1.442695, %v732_v7  ;;  %v724_v7 = vsub.f32 %v2555_v47, %v699_v32  ;;  %v1235_v32 = vpop.xlane.xlu0 %1234 }
 0x30e   : > { %1224 = vmax.xlane.f32.xlu1 %v2661_v15  ;;  %v1261_v55 = vsub.f32 %v2531_v29, %v1235_v32 }
 0x30f   : > { %1925 = vpow2.f32 %v762_v17  ;;  %v746_v16 = vmul.f32 1.442695, %v724_v7 }
 0x310   : > { %v1282_v7 = vmul.f32 1.442695, %v1261_v55 }
 0x312   : > { %v717_v25 = vpop.xlane.xlu2 %716 }
 0x313   : > { %v733_v13 = vsub.f32 %v2576_v59, %v717_v25 }
 0x315   : > { %v2665_v22 = vpop.eup %1925  ;;  %v764_v30 = vmul.f32 1.442695, %v733_v13  ;;  %v1241_v13 = vpop.xlane.xlu1 %1240 }
 0x316   : > { %794 = vadd.xlane.f32.xlu2 %v2665_v22  ;;  %v1264_v54 = vsub.f32 %v2547_v43, %v1241_v13 }
 0x317   : > { %1927 = vpow2.f32 %v764_v30 }
 0x318   : > { %1929 = vpow2.f32 %v750_v12  ;;  %v1288_v41 = vmul.f32 1.442695, %v1264_v54 }
 0x319   : > { %1931 = vpow2.f32 %v748_v58 }
 0x31a   : > { %v2669_v56 = vpop.xlane.xlu2 %1242  ;;  %1933 = vpow2.f32 %v746_v16  ;;  %v2697_v16 = vadd.f32 %v2521_v21, %v2479_v63  ;;  %v719_v21 = vsub.f32 %v2487_v3, %v2588_v4 }
 0x31d   : > { %v2671_v40 = vpop.eup %1927  ;;  %v1239_v3 = vpop.xlane.xlu1 %1238 }
 0x31e   : > { %796 = vadd.xlane.f32.xlu2 %v2671_v40  ;;  %v2677_v51 = vpop.eup %1929 }
 0x31f   : > { %v2682_v34 = vpop.eup %1931 }
 0x320   : > { %v2686_v47 = vpop.eup %1933 }
 0x322   : > { %v2675_v59 = vpop.xlane.xlu2 %1244 }
 0x326   : > { %782 = vadd.xlane.f32.xlu2 %v2677_v51 }
 0x32a   : > { %v1247_v17 = vpop.xlane.xlu2 %1246 }
 0x32b   : > { %v1267_v25 = vsub.f32 %v2592_v9, %v1247_v17  ;;  %v721_v9 = vsub.f32 %v2498_v8, %v2601_v20 }
 0x32d   : > { %v1294_v30 = vmul.f32 1.442695, %v1267_v25  ;;  %v740_v58 = vmul.f32 1.442695, %v721_v9  ;;  %v720_v25 = vsub.f32 %v2482_v1, %v2582_v62  ;;  %v736_v1 = vmul.f32 1.442695, %v719_v21 }
 0x32e   : > { %780 = vadd.xlane.f32.xlu2 %v2682_v34  ;;  %v718_v9 = vsub.f32 %v2492_v5, %v2595_v11  ;;  %v1237_v11 = vpop.xlane.xlu1 %1236 }
 0x32f   : > { %1935 = vpow2.f32 %v1294_v30  ;;  %v738_v8 = vmul.f32 1.442695, %v720_v25  ;;  %v1266_v25 = vsub.f32 %v2586_v2, %v2675_v59  ;;  %v1265_v2 = vsub.f32 %v2580_v61, %v2669_v56 }
 0x330   : > { %1937 = vpow2.f32 %v1288_v41  ;;  %v734_v55 = vmul.f32 1.442695, %v718_v9 }
 0x331   : > { %1939 = vpow2.f32 %v740_v58 }
 0x332   : > { %v1249_v60 = vpop.xlane.xlu2 %1248  ;;  %1941 = vpow2.f32 %v1282_v7 }
 0x333   : > { %1943 = vpow2.f32 %v738_v8  ;;  %v1268_v5 = vsub.f32 %v2598_v14, %v1249_v60  ;;  %v1290_v60 = vmul.f32 1.442695, %v1265_v2 }
 0x335   : > { %v2688_v12 = vpop.eup %1935 }
 0x336   : > { %778 = vadd.xlane.f32.xlu2 %v2686_v47  ;;  %1326 = vadd.xlane.f32.xlu1 %v2688_v12  ;;  %v2699_v17 = vpop.eup %1937 }
 0x337   : > { %3388 = vst [vmem:[#allocation21_spill] sm:$0xff] %v2699_v17  ;;  %v2706_v13 = vpop.eup %1939 }
 0x338   : > { %v2708_v30 = vpop.eup %1941 }
 0x339   : > { %3389 = vst [vmem:[#allocation22_spill] sm:$0xff] %v2708_v30  ;;  %v2715_v41 = vpop.eup %1943 }
 0x33a   : > { %v1251_v43 = vpop.xlane.xlu2 %1250 }
 0x33b   : > { %v1269_v4 = vsub.f32 %v2604_v23, %v1251_v43  ;;  %v1292_v23 = vmul.f32 1.442695, %v1266_v25  ;;  %v1296_v43 = vmul.f32 1.442695, %v1268_v5 }
 0x33d   : > { %v1298_v58 = vmul.f32 1.442695, %v1269_v4 }
 0x33e   : > { %1232 = vmax.xlane.f32.xlu2 %v2697_v16  ;;  %1320 = vadd.xlane.f32.xlu1 %v2699_v17 }
 0x342   : > { %v1253_v29 = vpop.xlane.xlu2 %1252 }
 0x343   : > { %v1270_v20 = vsub.f32 %v2608_v33, %v1253_v29 }
 0x345   : > { %v1300_v63 = vmul.f32 1.442695, %v1270_v20 }
 0x346   : > { %772 = vadd.xlane.f32.xlu2 %v2706_v13  ;;  %1314 = vadd.xlane.f32.xlu1 %v2708_v30 }
 0x347   : > { %1945 = vpow2.f32 %v1300_v63  ;;  %v1263_v63 = vsub.f32 %v2552_v46, %v1239_v3  ;;  %v1262_v46 = vsub.f32 %v2560_v49, %v1237_v11 }
 0x348   : > { %1947 = vpow2.f32 %v736_v1 }
 0x349   : > { %v1286_v59 = vmul.f32 1.442695, %v1263_v63  ;;  %v1284_v56 = vmul.f32 1.442695, %v1262_v46 }
 0x34a   : > { %v1255_v62 = vpop.xlane.xlu2 %1254 }
 0x34b   : > { %v1271_v54 = vsub.f32 %v2614_v48, %v1255_v62 }
 0x34d   : > { %v2717_v33 = vpop.eup %1945  ;;  %v1302_v32 = vmul.f32 1.442695, %v1271_v54 }
 0x34e   : > { %1332 = vadd.xlane.f32.xlu0 %v2717_v33  ;;  %770 = vadd.xlane.f32.xlu2 %v2715_v41  ;;  %v2724_v48 = vpop.eup %1947 }
 0x34f   : > { %1949 = vpow2.f32 %v1302_v32 }
 0x350   : > { %1951 = vpow2.f32 %v734_v55 }
 0x351   : > { %1953 = vpow2.f32 %v1298_v58 }
 0x352   : > { %v2733_v8 = vpop.xlane.xlu2 %784  ;;  %1955 = vpow2.f32 %v1292_v23 }
 0x353   : > { %1957 = vpow2.f32 %v1296_v43 }
 0x354   : > { %1959 = vpow2.f32 %v1286_v59 }
 0x355   : > { %v2726_v7 = vpop.eup %1949  ;;  %1961 = vpow2.f32 %v1290_v60 }
 0x356   : > { %1334 = vadd.xlane.f32.xlu0 %v2726_v7  ;;  %768 = vadd.xlane.f32.xlu2 %v2724_v48  ;;  %v2735_v29 = vpop.eup %1951  ;;  %1963 = vpow2.f32 %v1284_v56 }
 0x357   : > { %v2737_v20 = vpop.eup %1953 }
 0x358   : > { %v2746_v21 = vpop.eup %1955 }
 0x359   : > { %v2748_v1 = vpop.eup %1957 }
 0x35a   : > { %v2750_v62 = vpop.xlane.xlu2 %786  ;;  %v2755_v54 = vpop.eup %1959 }
 0x35b   : > { %3390 = vst [vmem:[#allocation23_spill] sm:$0xff] %v2755_v54  ;;  %v2757_v32 = vpop.eup %1961 }
 0x35c   : > { %v2765_v25 = vpop.eup %1963 }
 0x35d   : > { %3391 = vst [vmem:[#allocation24_spill] sm:$0xff] %v2765_v25 }
 0x35e   : > { %1330 = vadd.xlane.f32.xlu0 %v2737_v20  ;;  %766 = vadd.xlane.f32.xlu2 %v2735_v29 }
 0x361   : > { %v2744_v14 = vpop.xlane.xlu1 %776 }
 0x362   : > { %v2761_v9 = vpop.xlane.xlu2 %788 }
 0x366   : > { %1328 = vadd.xlane.f32.xlu0 %v2748_v1  ;;  %1324 = vadd.xlane.f32.xlu2 %v2746_v21 }
 0x369   : > { %v1231_v61 = vpop.xlane.xlu1 %1230 }
 0x36a   : > { %v1259_v3 = vsub.f32 %v2638_v37, %v1231_v61  ;;  %v2768_v5 = vpop.xlane.xlu2 %790 }
 0x36b   : > { %vm971_vm15 = vweird.f32 %v2768_v5 }
 0x36c   : > { %v1278_v49 = vmul.f32 1.442695, %v1259_v3 }
 0x36e   : > { %1322 = vadd.xlane.f32.xlu0 %v2757_v32  ;;  %1318 = vadd.xlane.f32.xlu2 %v2755_v54 }
 0x371   : > { %v1229_v4 = vpop.xlane.xlu1 %1228 }
 0x372   : > { %v1258_v55 = vsub.f32 %v2647_v57, %v1229_v4 }
 0x374   : > { %v1276_v58 = vmul.f32 1.442695, %v1258_v55 }
 0x376   : > { %1965 = vpow2.f32 %v1276_v58  ;;  %1316 = vadd.xlane.f32.xlu0 %v2765_v25 }
 0x377   : > { %1967 = vpow2.f32 %v1278_v49 }
 0x379   : > { %v2770_v11 = vpop.xlane.xlu1 %1226  ;;  %v2778_v37 = vpop.xlane.xlu2 %792 }
 0x37a   : > { %vm985_vm11 = vweird.f32 %v2778_v37 }
 0x37c   : > { %v2772_v23 = vpop.eup %1965 }
 0x37d   : > { %3392 = vst [vmem:[#allocation25_spill] sm:$0xff] %v2772_v23  ;;  %v2774_v43 = vpop.eup %1967  ;;  %1308 = vadd.xlane.f32.xlu1 %v2772_v23 }
 0x37e   : > { %3393 = vst [vmem:[#allocation26_spill] sm:$0xff] %v2774_v43  ;;  %1310 = vadd.xlane.f32.xlu0 %v2774_v43 }
 0x381   : > { %v1225_v57 = vpop.xlane.xlu1 %1224 }
 0x382   : > { %v1256_v63 = vsub.f32 %v2661_v15, %v1225_v57 }
 0x384   : > { %v1272_v2 = vmul.f32 1.442695, %v1256_v63 }
 0x386   : > { %1969 = vpow2.f32 %v1272_v2 }
 0x389   : > { %v795_v59 = vpop.xlane.xlu2 %794 }
 0x38a   : > { %1971 = vrcp.f32 %v795_v59  ;;  %vm999_vm4 = vweird.f32 %v795_v59  ;;  %v1005_v39 = vand.u32 2147483648, %v795_v59 }
 0x38b   : > { %1973 = vrcp.f32 %v2778_v37 }
 0x38c   : > { %v2782_v60 = vpop.eup %1969  ;;  %1975 = vrcp.f32 %v2768_v5  ;;  %v1006_v54 = vor.u32 1.1754944e-38, %v1005_v39 }
 0x38d   : > { %3394 = vst [vmem:[#allocation27_spill] sm:$0xff] %v2782_v60  ;;  %1304 = vadd.xlane.f32.xlu0 %v2782_v60  ;;  %1977 = vrcp.f32 %v2761_v9 }
 0x390   : > { %v1972_v46 = vpop.eup %1971 }
 0x391   : > { %v2786_v61 = vpop.eup %1973  ;;  %v995_v56 = vmul.f32 %v1972_v46, %v795_v59  ;;  %v797_v3 = vpop.xlane.xlu2 %796  ;;  %vm1000_vm2 = vweird.f32 %v1972_v46 }
 0x392   : > { %1979 = vrcp.f32 %v797_v3  ;;  %v981_v15 = vmul.f32 %v2786_v61, %v2778_v37  ;;  %v2791_v4 = vpop.eup %1975  ;;  %v1019_v60 = vand.u32 2147483648, %v797_v3  ;;  %vm1013_vm5 = vweird.f32 %v797_v3  ;;  %vm2808_vm6 = vmor %vm999_vm4, %vm1000_vm2 }
 0x393   : > { %1981 = vrcp.f32 %v2750_v62  ;;  %v996_v55 = vsub.f32 1.0, %v995_v56  ;;  %v2794_v49 = vpop.eup %1977  ;;  %v967_v57 = vmul.f32 %v2791_v4, %v2768_v5  ;;  %vm986_vm8 = vweird.f32 %v2786_v61 }
 0x394   : > { %v982_v63 = vsub.f32 1.0, %v981_v15  ;;  %1983 = vrcp.f32 %v2733_v8  ;;  %v953_v50 = vmul.f32 %v2794_v49, %v2761_v9  ;;  %v1017_v15 = vand.u32 2147483647, %v797_v3  ;;  %vm2831_vm12 = vmor %vm985_vm11, %vm986_vm8 }
 0x395   : > { %v997_v2 = vmul.f32 %v1972_v46, %v996_v55  ;;  %v968_v56 = vsub.f32 1.0, %v967_v57  ;;  %vm972_vm13 = vweird.f32 %v2791_v4  ;;  %vm958_vm1 = vweird.f32 %v2794_v49 }
 0x396   : > { %v983_v42 = vmul.f32 %v2786_v61, %v982_v63  ;;  %v954_v30 = vsub.f32 1.0, %v953_v50  ;;  %vm1018_vm9 = vcmp.eq.f32.partialorder %v1017_v15, 8.507059e+37  ;;  %vm2849_vm0 = vmor %vm971_vm15, %vm972_vm13 }
 0x397   : > { %v998_v55 = vadd.f32 %v1972_v46, %v997_v2  ;;  %v969_v57 = vmul.f32 %v2791_v4, %v968_v56  ;;  %v991_v56 = vand.u32 2147483648, %v2778_v37 }
 0x398   : > { %v1980_v58 = vpop.eup %1979 }
 0x399   : > { %v1009_v10 = vmul.f32 %v1980_v58, %v797_v3  ;;  %v2798_v6 = vpop.xlane.xlu2 %782  ;;  %v2800_v53 = vpop.eup %1981  ;;  %vm1014_vm3 = vweird.f32 %v1980_v58  ;;  %v984_v3 = vadd.f32 %v2786_v61, %v983_v42  ;;  %v955_v42 = vmul.f32 %v2794_v49, %v954_v30 }
 0x39a   : > { %v939_v43 = vmul.f32 %v2800_v53, %v2750_v62  ;;  %1985 = vrcp.f32 %v2798_v6  ;;  %vm1015_vm7 = vmor %vm1013_vm5, %vm1014_vm3  ;;  %v2815_v63 = vpop.eup %1983  ;;  %vm957_vm3 = vweird.f32 %v2761_v9  ;;  %vm944_vm5 = vweird.f32 %v2800_v53 }
 0x39b   : > { %v1010_v45 = vsub.f32 1.0, %v1009_v10  ;;  %v1003_v10 = vand.u32 2147483647, %v795_v59  ;;  %vm2872_vm4 = vmor %vm957_vm3, %vm958_vm1  ;;  %vm915_vm15 = vweird.f32 %v2798_v6 }
 0x39d   : > { %v1011_v23 = vmul.f32 %v1980_v58, %v1010_v45  ;;  %v1020_v45 = vor.u32 1.1754944e-38, %v1019_v60  ;;  %vm1004_vm10 = vcmp.eq.f32.partialorder %v1003_v10, 8.507059e+37  ;;  %v989_v60 = vand.u32 2147483647, %v2778_v37 }
 0x39e   : > { %v970_v37 = vadd.f32 %v2791_v4, %v969_v57 }
 0x39f   : > { %v1012_v25 = vadd.f32 %v1980_v58, %v1011_v23  ;;  %v1002_v23 = vsel %vm2808_vm6, %v1972_v46, %v998_v55  ;;  %v977_v46 = vand.u32 2147483648, %v2768_v5  ;;  %vm990_vm14 = vcmp.eq.f32.partialorder %v989_v60, 8.507059e+37 }
 0x3a0   : > { %v1007_v36 = vsel %vm1004_vm10, %v1006_v54, %v1002_v23  ;;  %v992_v54 = vor.u32 1.1754944e-38, %v991_v56  ;;  %vm929_vm10 = vweird.f32 %v2733_v8 }
 0x3a1   : > { %v2817_v2 = vpop.xlane.xlu2 %780  ;;  %v1016_v50 = vsel %vm1015_vm7, %v1980_v58, %v1012_v25  ;;  %v925_v25 = vmul.f32 %v2815_v63, %v2733_v8  ;;  %v940_v58 = vsub.f32 1.0, %v939_v43  ;;  %v2841_v43 = vpop.eup %1985  ;;  %v1036_v15 = vmul.f32 %v2665_v22, %v1007_v36 }
 0x3a2   : > { %v1021_v59 = vsel %vm1018_vm9, %v1020_v45, %v1016_v50  ;;  %1987 = vrcp.f32 %v2817_v2  ;;  %v911_v57 = vmul.f32 %v2841_v43, %v2798_v6  ;;  %v956_v45 = vadd.f32 %v2794_v49, %v955_v42 }
 0x3a3   : > { %v1037_v17 = vmul.f32 %v2671_v40, %v1021_v59  ;;  %v988_v40 = vsel %vm2831_vm12, %v2786_v61, %v984_v3  ;;  %v926_v30 = vsub.f32 1.0, %v925_v25  ;;  %v941_v55 = vmul.f32 %v2800_v53, %v940_v58  ;;  %v2866_v59 = vpop.xlane.xlu0 %774 }
 0x3a4   : > { %1989 = vrcp.f32 %v2744_v14  ;;  %v993_v61 = vsel %vm990_vm14, %v992_v54, %v988_v40  ;;  %v978_v23 = vor.u32 1.1754944e-38, %v977_v46  ;;  %v963_v3 = vand.u32 2147483648, %v2761_v9 }
 0x3a5   : > { %1038 = vmatpush.xpose.msrb.mxu2 %v1037_v17  ;;  %v975_v17 = vand.u32 2147483647, %v2768_v5  ;;  %v974_v5 = vsel %vm2849_vm0, %v2791_v4, %v970_v37  ;;  %v1035_v56 = vmul.f32 %v2654_v27, %v993_v61  ;;  %v961_v4 = vand.u32 2147483647, %v2761_v9 }
 0x3a6   : > { %v927_v60 = vmul.f32 %v2815_v63, %v926_v30  ;;  %v912_v36 = vsub.f32 1.0, %v911_v57  ;;  %v960_v27 = vsel %vm2872_vm4, %v2794_v49, %v956_v45  ;;  %v942_v9 = vadd.f32 %v2800_v53, %v941_v55 }
 0x3a7   : > { %vm976_vm2 = vcmp.eq.f32.partialorder %v975_v17, 8.507059e+37  ;;  %v964_v40 = vor.u32 1.1754944e-38, %v963_v3  ;;  %v949_v37 = vand.u32 2147483648, %v2750_v62  ;;  %vm962_vm6 = vcmp.eq.f32.partialorder %v961_v4, 8.507059e+37 }
 0x3a8   : > { %v2862_v50 = vpop.eup %1987  ;;  %v979_v25 = vsel %vm976_vm2, %v978_v23, %v974_v5  ;;  %vm943_vm7 = vweird.f32 %v2750_v62  ;;  %v947_v46 = vand.u32 2147483647, %v2750_v62  ;;  %v928_v30 = vadd.f32 %v2815_v63, %v927_v60 }
 0x3a9   : > { %1039 = vmatpush.xpose.msrb.mxu2 %v1036_v15  ;;  %v2855_v22 = vpop.xlane.xlu2 %778  ;;  %v897_v39 = vmul.f32 %v2862_v50, %v2817_v2  ;;  %v1034_v54 = vmul.f32 %v2640_v52, %v979_v25  ;;  %v965_v17 = vsel %vm962_vm6, %v964_v40, %v960_v27  ;;  %vm2894_vm8 = vmor %vm943_vm7, %vm944_vm5  ;;  %vm930_vm9 = vweird.f32 %v2815_v63 }
 0x3aa   : > { %1991 = vrcp.f32 %v2855_v22  ;;  %v2883_v42 = vpop.eup %1989  ;;  %v913_v52 = vmul.f32 %v2841_v43, %v912_v36  ;;  %v946_v10 = vsel %vm2894_vm8, %v2800_v53, %v942_v9  ;;  %v950_v5 = vor.u32 1.1754944e-38, %v949_v37  ;;  %vm2910_vm12 = vmor %vm929_vm10, %vm930_vm9 }
 0x3ab   : > { %1993 = vrcp.f32 %v2866_v59  ;;  %v898_v55 = vsub.f32 1.0, %v897_v39  ;;  %v935_v45 = vand.u32 2147483648, %v2733_v8  ;;  %v1033_v23 = vmul.f32 %v2632_v44, %v965_v17 }
 0x3ac   : > { %vm948_vm11 = vcmp.eq.f32.partialorder %v947_v46, 8.507059e+37  ;;  %v869_v53 = vmul.f32 %v2883_v42, %v2744_v14  ;;  %v932_v25 = vsel %vm2910_vm12, %v2815_v63, %v928_v30  ;;  %v914_v36 = vadd.f32 %v2841_v43, %v913_v52 }
 0x3ad   : > { %1040 = vmatpush.xpose.msrb.mxu2 %v1035_v56  ;;  %v933_v56 = vand.u32 2147483647, %v2733_v8  ;;  %v951_v60 = vsel %vm948_vm11, %v950_v5, %v946_v10  ;;  %v899_v44 = vmul.f32 %v2862_v50, %v898_v55  ;;  %vm916_vm13 = vweird.f32 %v2841_v43 }
 0x3ae   : > { %v1257_v8 = vsub.f32 %v2652_v18, %v2770_v11  ;;  %v936_v39 = vor.u32 1.1754944e-38, %v935_v45  ;;  %v921_v27 = vand.u32 2147483648, %v2798_v6  ;;  %v1032_v9 = vmul.f32 %v2626_v35, %v951_v60  ;;  %vm2933_vm0 = vmor %vm915_vm15, %vm916_vm13 }
 0x3af   : > { %vm934_vm14 = vcmp.eq.f32.partialorder %v933_v56, 8.507059e+37  ;;  %v919_v63 = vand.u32 2147483647, %v2798_v6  ;;  %v870_v37 = vsub.f32 1.0, %v869_v53  ;;  %v918_v35 = vsel %vm2933_vm0, %v2841_v43, %v914_v36 }
 0x3b0   : > { %v2890_v15 = vpop.eup %1991  ;;  %v900_v6 = vadd.f32 %v2862_v50, %v899_v44  ;;  %vm902_vm1 = vweird.f32 %v2862_v50  ;;  %v1274_v17 = vmul.f32 1.442695, %v1257_v8  ;;  %v922_v49 = vor.u32 1.1754944e-38, %v921_v27 }
 0x3b1   : > { %v883_v61 = vmul.f32 %v2890_v15, %v2855_v22  ;;  %1041 = vmatpush.xpose.msrb.mxu2 %v1034_v54  ;;  %v1233_v62 = vpop.xlane.xlu2 %1232  ;;  %v2915_v4 = vpop.eup %1993  ;;  %v937_v54 = vsel %vm934_vm14, %v936_v39, %v932_v25  ;;  %v907_v30 = vand.u32 2147483648, %v2817_v2  ;;  %vm920_vm2 = vcmp.eq.f32.partialorder %v919_v63, 8.507059e+37 }
 0x3b2   : > { %v1260_v57 = vsub.f32 %v2697_v16, %v1233_v62  ;;  %v855_v40 = vmul.f32 %v2915_v4, %v2866_v59  ;;  %v1031_v52 = vmul.f32 %v2620_v19, %v937_v54  ;;  %vm901_vm3 = vweird.f32 %v2817_v2 }
 0x3b3   : > { %v884_v58 = vsub.f32 1.0, %v883_v61  ;;  %v905_v55 = vand.u32 2147483647, %v2817_v2  ;;  %v923_v62 = vsel %vm920_vm2, %v922_v49, %v918_v35  ;;  %vm2952_vm4 = vmor %vm901_vm3, %vm902_vm1  ;;  %vm888_vm5 = vweird.f32 %v2890_v15 }
 0x3b4   : > { %v1280_v16 = vmul.f32 1.442695, %v1260_v57  ;;  %v856_v43 = vsub.f32 1.0, %v855_v40  ;;  %v871_v57 = vmul.f32 %v2883_v42, %v870_v37  ;;  %v904_v19 = vsel %vm2952_vm4, %v2862_v50, %v900_v6 }
 0x3b5   : > { %1042 = vmatpush.xpose.msrb.mxu2 %v1033_v23  ;;  %v885_v18 = vmul.f32 %v2890_v15, %v884_v58  ;;  %v908_v2 = vor.u32 1.1754944e-38, %v907_v30  ;;  %v893_v45 = vand.u32 2147483648, %v2855_v22  ;;  %v1030_v23 = vmul.f32 %v2677_v51, %v923_v62 }
 0x3b6   : > { %1995 = vpow2.f32 %v1280_v16  ;;  %vm906_vm6 = vcmp.eq.f32.partialorder %v905_v55, 8.507059e+37  ;;  %vm887_vm7 = vweird.f32 %v2855_v22  ;;  %v891_v3 = vand.u32 2147483647, %v2855_v22  ;;  %v3017_v55 = vpop.xlane.xlu1 %1326 }
 0x3b7   : > { %v886_v5 = vadd.f32 %v2890_v15, %v885_v18  ;;  %v857_v53 = vmul.f32 %v2915_v4, %v856_v43  ;;  %v909_v50 = vsel %vm906_vm6, %v908_v2, %v904_v19  ;;  %vm2970_vm8 = vmor %vm887_vm7, %vm888_vm5  ;;  %v872_v44 = vadd.f32 %v2883_v42, %v871_v57 }
 0x3b8   : > { %vm874_vm9 = vweird.f32 %v2883_v42  ;;  %v894_v58 = vor.u32 1.1754944e-38, %v893_v45  ;;  %vm873_vm10 = vweird.f32 %v2744_v14  ;;  %v877_v36 = vand.u32 2147483647, %v2744_v14 }
 0x3b9   : > { %1043 = vmatpush.xpose.msrb.mxu2 %v1032_v9  ;;  %v2938_v11 = vpop.xlane.xlu2 %772  ;;  %v890_v22 = vsel %vm2970_vm8, %v2890_v15, %v886_v5  ;;  %v879_v8 = vand.u32 2147483648, %v2744_v14  ;;  %v1029_v27 = vmul.f32 %v2682_v34, %v909_v50  ;;  %vm892_vm11 = vcmp.eq.f32.partialorder %v891_v3, 8.507059e+37  ;;  %vm875_vm12 = vmor %vm873_vm10, %vm874_vm9 }
 0x3ba   : > { %1997 = vrcp.f32 %v2938_v11  ;;  %v895_v15 = vsel %vm892_vm11, %v894_v58, %v890_v22  ;;  %v863_v63 = vand.u32 2147483647, %v2866_v59  ;;  %v876_v37 = vsel %vm875_vm12, %v2883_v42, %v872_v44 }
 0x3bb   : > { %1999 = vpow2.f32 %v1274_v17  ;;  %v858_v14 = vadd.f32 %v2915_v4, %v857_v53  ;;  %vm860_vm13 = vweird.f32 %v2915_v4  ;;  %v880_v54 = vor.u32 1.1754944e-38, %v879_v8 }
 0x3bc   : > { %v2950_v61 = vpop.eup %1995  ;;  %v865_v34 = vand.u32 2147483648, %v2866_v59  ;;  %v1028_v46 = vmul.f32 %v2686_v47, %v895_v15  ;;  %vm878_vm14 = vcmp.eq.f32.partialorder %v877_v36, 8.507059e+37  ;;  %vm859_vm15 = vweird.f32 %v2866_v59 }
 0x3bd   : > { %1044 = vmatpush.xpose.msrb.mxu2 %v1031_v52  ;;  %1312 = vadd.xlane.f32.xlu2 %v2950_v61  ;;  %v881_v18 = vsel %vm878_vm14, %v880_v54, %v876_v37  ;;  %vm3001_vm0 = vmor %vm859_vm15, %vm860_vm13  ;;  %vm864_vm1 = vcmp.eq.f32.partialorder %v863_v63, 8.507059e+37  ;;  %v851_v52 = vand.u32 2147483648, %v2938_v11  ;;  %vm845_vm3 = vweird.f32 %v2938_v11 }
 0x3be   : > { %v862_v49 = vsel %vm3001_vm0, %v2915_v4, %v858_v14  ;;  %v866_v30 = vor.u32 1.1754944e-38, %v865_v34  ;;  %v1027_v43 = vmul.f32 %v2630_v38, %v881_v18  ;;  %v849_v4 = vand.u32 2147483647, %v2938_v11  ;;  %v3057_v54 = vpop.xlane.xlu1 %1320 }
 0x3bf   : > { %v852_v5 = vor.u32 1.1754944e-38, %v851_v52 }
 0x3c0   : > { %v2967_v56 = vpop.eup %1997  ;;  %v867_v10 = vsel %vm864_vm1, %v866_v30, %v862_v49  ;;  %vm850_vm5 = vcmp.eq.f32.partialorder %v849_v4, 8.507059e+37 }
 0x3c1   : > { %v841_v60 = vmul.f32 %v2967_v56, %v2938_v11  ;;  %1045 = vmatpush.xpose.msrb.mxu2 %v1030_v23  ;;  %v2976_v25 = vpop.xlane.xlu0 %1332  ;;  %v2978_v51 = vpop.xlane.xlu2 %770  ;;  %vm846_vm2 = vweird.f32 %v2967_v56  ;;  %v1026_v38 = vmul.f32 %v2618_v0, %v867_v10 }
 0x3c2   : > { %2001 = vrcp.f32 %v2978_v51  ;;  %v2990_v9 = vpop.eup %1999  ;;  %vm847_vm4 = vmor %vm845_vm3, %vm846_vm2  ;;  %v837_v2 = vand.u32 2147483648, %v2978_v51  ;;  %v835_v11 = vand.u32 2147483647, %v2978_v51  ;;  %vm831_vm7 = vweird.f32 %v2978_v51 }
 0x3c3   : > { %v842_v39 = vsub.f32 1.0, %v841_v60  ;;  %vm1537_vm15 = vweird.f32 %v2976_v25 }
 0x3c4   : > { %v838_v22 = vor.u32 1.1754944e-38, %v837_v2  ;;  %vm836_vm9 = vcmp.eq.f32.partialorder %v835_v11, 8.507059e+37 }
 0x3c5   : > { %v843_v40 = vmul.f32 %v2967_v56, %v842_v39  ;;  %1046 = vmatpush.xpose.msrb.mxu2 %v1029_v27  ;;  %1306 = vadd.xlane.f32.xlu2 %v2990_v9 }
 0x3c7   : > { %v844_v47 = vadd.f32 %v2967_v56, %v843_v40 }
 0x3c8   : > { %v2002_v6 = vpop.eup %2001 }
 0x3c9   : > { %1047 = vmatpush.xpose.msrb.mxu2 %v1028_v46  ;;  %v3005_v42 = vpop.xlane.xlu0 %1334  ;;  %v3007_v17 = vpop.xlane.xlu2 %768  ;;  %v827_v59 = vmul.f32 %v2002_v6, %v2978_v51  ;;  %v848_v57 = vsel %vm847_vm4, %v2967_v56, %v844_v47  ;;  %vm832_vm6 = vweird.f32 %v2002_v6 }
 0x3ca   : > { %2003 = vrcp.f32 %v3005_v42  ;;  %v853_v23 = vsel %vm850_vm5, %v852_v5, %v848_v57  ;;  %vm833_vm8 = vmor %vm831_vm7, %vm832_vm6  ;;  %v823_v37 = vand.u32 2147483648, %v3007_v17  ;;  %vm817_vm11 = vweird.f32 %v3007_v17 }
 0x3cb   : > { %2005 = vrcp.f32 %v3007_v17  ;;  %v828_v62 = vsub.f32 1.0, %v827_v59  ;;  %v1025_v44 = vmul.f32 %v2706_v13, %v853_v23  ;;  %v821_v13 = vand.u32 2147483647, %v3007_v17 }
 0x3cc   : > { %2007 = vrcp.f32 %v2976_v25  ;;  %v824_v30 = vor.u32 1.1754944e-38, %v823_v37  ;;  %vm1551_vm0 = vweird.f32 %v3005_v42  ;;  %v1555_v2 = vand.u32 2147483647, %v3005_v42 }
 0x3cd   : > { %1048 = vmatpush.xpose.msrb.mxu2 %v1027_v43  ;;  %2009 = vrcp.f32 %v3017_v55  ;;  %v829_v19 = vmul.f32 %v2002_v6, %v828_v62  ;;  %vm822_vm13 = vcmp.eq.f32.partialorder %v821_v13, 8.507059e+37 }
 0x3ce   : > { %vm1556_vm5 = vcmp.eq.f32.partialorder %v1555_v2, 8.507059e+37 }
 0x3cf   : > { %v830_v3 = vadd.f32 %v2002_v6, %v829_v19 }
 0x3d0   : > { %v3029_v45 = vpop.eup %2003 }
 0x3d1   : > { %v2006_v53 = vpop.eup %2005  ;;  %v1547_v56 = vmul.f32 %v3029_v45, %v3005_v42  ;;  %1049 = vmatpush.xpose.msrb.mxu2 %v1026_v38  ;;  %v3033_v50 = vpop.xlane.xlu0 %1330  ;;  %v834_v58 = vsel %vm833_vm8, %v2002_v6, %v830_v3  ;;  %vm1552_vm14 = vweird.f32 %v3029_v45  ;;  %v1543_v3 = vand.u32 2147483648, %v2976_v25 }
 0x3d2   : > { %v3035_v16 = vpop.xlane.xlu2 %766  ;;  %v3038_v0 = vpop.eup %2007  ;;  %v813_v60 = vmul.f32 %v2006_v53, %v3007_v17  ;;  %2011 = vrcp.f32 %v3033_v50  ;;  %v839_v39 = vsel %vm836_vm9, %v838_v22, %v834_v58  ;;  %vm818_vm10 = vweird.f32 %v2006_v53  ;;  %vm3089_vm1 = vmor %vm1551_vm0, %vm1552_vm14 }
 0x3d3   : > { %2013 = vrcp.f32 %v3035_v16  ;;  %v3044_v36 = vpop.eup %2009  ;;  %v1533_v51 = vmul.f32 %v3038_v0, %v2976_v25  ;;  %v1548_v27 = vsub.f32 1.0, %v1547_v56  ;;  %v1024_v40 = vmul.f32 %v2715_v41, %v839_v39  ;;  %vm819_vm12 = vmor %vm817_vm11, %vm818_vm10 }
 0x3d4   : > { %v814_v8 = vsub.f32 1.0, %v813_v60  ;;  %v3050_v63 = vmul.f32 %v3044_v36, %v3017_v55  ;;  %v1557_v17 = vand.u32 2147483648, %v3005_v42  ;;  %v807_v38 = vand.u32 2147483647, %v3035_v16 }
 0x3d5   : > { %1050 = vmatpush.xpose.msrb.mxu2 %v1025_v44  ;;  %v1534_v18 = vsub.f32 1.0, %v1533_v51  ;;  %v1549_v35 = vmul.f32 %v3029_v45, %v1548_v27  ;;  %v809_v11 = vand.u32 2147483648, %v3035_v16  ;;  %vm1538_vm3 = vweird.f32 %v3038_v0 }
 0x3d6   : > { %v815_v15 = vmul.f32 %v2006_v53, %v814_v8  ;;  %v1492_v59 = vsub.f32 1.0, %v3050_v63  ;;  %v1558_v39 = vor.u32 1.1754944e-38, %v1557_v17  ;;  %vm803_vm4 = vweird.f32 %v3035_v16  ;;  %vm3115_vm8 = vmor %vm1537_vm15, %vm1538_vm3 }
 0x3d7   : > { %v1535_v62 = vmul.f32 %v3038_v0, %v1534_v18  ;;  %v1550_v10 = vadd.f32 %v3029_v45, %v1549_v35  ;;  %v1541_v51 = vand.u32 2147483647, %v2976_v25  ;;  %vm808_vm7 = vcmp.eq.f32.partialorder %v807_v38, 8.507059e+37 }
 0x3d8   : > { %v3055_v14 = vpop.eup %2011  ;;  %v816_v34 = vadd.f32 %v2006_v53, %v815_v15  ;;  %v810_v15 = vor.u32 1.1754944e-38, %v809_v11  ;;  %vm1523_vm10 = vweird.f32 %v3033_v50  ;;  %vm1496_vm14 = vweird.f32 %v3044_v36  ;;  %v3167_v11 = vpop.xlane.xlu1 %1314 }
 0x3d9   : > { %v3059_v46 = vpop.eup %2013  ;;  %v1519_v6 = vmul.f32 %v3055_v14, %v3033_v50  ;;  %v3064_v49 = vpop.xlane.xlu0 %1328  ;;  %1051 = vmatpush.xpose.msrb.mxu2 %v1024_v40  ;;  %v1554_v44 = vsel %vm3089_vm1, %v3029_v45, %v1550_v10  ;;  %v1536_v58 = vadd.f32 %v3038_v0, %v1535_v62  ;;  %vm1524_vm9 = vweird.f32 %v3055_v14 }
 0x3da   : > { %v3066_v41 = vpop.xlane.xlu2 %1324  ;;  %v799_v47 = vmul.f32 %v3059_v46, %v3035_v16  ;;  %2015 = vrcp.f32 %v3064_v49  ;;  %v820_v4 = vsel %vm819_vm12, %v2006_v53, %v816_v34  ;;  %vm804_vm2 = vweird.f32 %v3059_v46  ;;  %vm3133_vm12 = vmor %vm1523_vm10, %vm1524_vm9 }
 0x3db   : > { %2017 = vrcp.f32 %v3057_v54  ;;  %v1520_v52 = vsub.f32 1.0, %v1519_v6  ;;  %v825_v57 = vsel %vm822_vm13, %v824_v30, %v820_v4  ;;  %vm805_vm6 = vmor %vm803_vm4, %vm804_vm2  ;;  %v1559_v40 = vsel %vm1556_vm5, %v1558_v39, %v1554_v44 }
 0x3dc   : > { %v800_v43 = vsub.f32 1.0, %v799_v47  ;;  %2019 = vrcp.f32 %v3066_v41  ;;  %v1023_v5 = vmul.f32 %v2724_v48, %v825_v57  ;;  %v1540_v25 = vsel %vm3115_vm8, %v3038_v0, %v1536_v58 }
 0x3dd   : > { %v1521_v56 = vmul.f32 %v3055_v14, %v1520_v52  ;;  %v1529_v6 = vand.u32 2147483648, %v3033_v50  ;;  %v1575_v30 = vmul.f32 %v2726_v7, %v1559_v40  ;;  %vm1542_vm11 = vcmp.eq.f32.partialorder %v1541_v51, 8.507059e+37 }
 0x3de   : > { %v801_v19 = vmul.f32 %v3059_v46, %v800_v43  ;;  %1052 = vmatpush.xpose.msrb.mxu2 %v1023_v5  ;;  %v1527_v43 = vand.u32 2147483647, %v3033_v50  ;;  %v1493_v0 = vmul.f32 %v3044_v36, %v1492_v59  ;;  %v1515_v59 = vand.u32 2147483648, %v3064_v49 }
 0x3df   : > { %v1522_v37 = vadd.f32 %v3055_v14, %v1521_v56  ;;  %v1530_v63 = vor.u32 1.1754944e-38, %v1529_v6  ;;  %vm1509_vm15 = vweird.f32 %v3064_v49  ;;  %v1513_v17 = vand.u32 2147483647, %v3064_v49 }
 0x3e0   : > { %v3086_v23 = vpop.eup %2015  ;;  %v802_v48 = vadd.f32 %v3059_v46, %v801_v19  ;;  %vm1528_vm0 = vcmp.eq.f32.partialorder %v1527_v43, 8.507059e+37  ;;  %v1494_v38 = vadd.f32 %v3044_v36, %v1493_v0  ;;  %vm1495_vm2 = vweird.f32 %v3017_v55 }
 0x3e1   : > { %v3096_v42 = vpop.eup %2017  ;;  %v1505_v60 = vmul.f32 %v3086_v23, %v3064_v49  ;;  %v3100_v22 = vpop.xlane.xlu0 %1322  ;;  %v1526_v7 = vsel %vm3133_vm12, %v3055_v14, %v1522_v37  ;;  %vm1510_vm13 = vweird.f32 %v3086_v23  ;;  %v1501_v53 = vand.u32 2147483648, %v3017_v55  ;;  %vm3180_vm4 = vmor %vm1495_vm2, %vm1496_vm14 }
 0x3e2   : > { %v3107_v8 = vpop.eup %2019  ;;  %2021 = vrcp.f32 %v3100_v22  ;;  %v806_v45 = vsel %vm805_vm6, %v3059_v46, %v802_v48  ;;  %v3124_v18 = vpop.xlane.xlu2 %1318  ;;  %v1544_v46 = vor.u32 1.1754944e-38, %v1543_v3  ;;  %v1449_v19 = vmul.f32 %v3096_v42, %v3057_v54  ;;  %vm3162_vm1 = vmor %vm1509_vm15, %vm1510_vm13 }
 0x3e3   : > { %v1506_v27 = vsub.f32 1.0, %v1505_v60  ;;  %v1477_v34 = vmul.f32 %v3107_v8, %v3066_v41  ;;  %v811_v35 = vsel %vm808_vm7, %v810_v15, %v806_v45  ;;  %2023 = vrcp.f32 %v3124_v18 }
 0x3e4   : > { %v1022_v47 = vmul.f32 %v2735_v29, %v811_v35  ;;  %v1545_v62 = vsel %vm1542_vm11, %v1544_v46, %v1540_v25  ;;  %v1531_v5 = vsel %vm1528_vm0, %v1530_v63, %v1526_v7  ;;  %v1516_v56 = vor.u32 1.1754944e-38, %v1515_v59 }
 0x3e5   : > { %v1507_v16 = vmul.f32 %v3086_v23, %v1506_v27  ;;  %v1478_v29 = vsub.f32 1.0, %v1477_v34  ;;  %v1574_v14 = vmul.f32 %v2717_v33, %v1545_v62  ;;  %v1573_v48 = vmul.f32 %v2737_v20, %v1531_v5 }
 0x3e6   : > { %1053 = vmatpush.xpose.msrb.mxu2 %v1022_v47  ;;  %vm1514_vm3 = vcmp.eq.f32.partialorder %v1513_v17, 8.507059e+37  ;;  %v1499_v44 = vand.u32 2147483647, %v3017_v55  ;;  %v1450_v58 = vsub.f32 1.0, %v1449_v19  ;;  %v1498_v39 = vsel %vm3180_vm4, %v3044_v36, %v1494_v38 }
 0x3e7   : > { %v1508_v57 = vadd.f32 %v3086_v23, %v1507_v16  ;;  %vm1482_vm5 = vweird.f32 %v3107_v8  ;;  %v1502_v55 = vor.u32 1.1754944e-38, %v1501_v53  ;;  %v1487_v45 = vand.u32 2147483648, %v3066_v41 }
 0x3e8   : > { %v3138_v4 = vpop.eup %2021  ;;  %vm1481_vm6 = vweird.f32 %v3066_v41  ;;  %vm1500_vm7 = vcmp.eq.f32.partialorder %v1499_v44, 8.507059e+37  ;;  %v1485_v40 = vand.u32 2147483647, %v3066_v41  ;;  %v1451_v13 = vmul.f32 %v3096_v42, %v1450_v58 }
 0x3e9   : > { %v1463_v10 = vmul.f32 %v3138_v4, %v3100_v22  ;;  %v3149_v50 = vpop.xlane.xlu0 %1316  ;;  %1054 = vmatmul.f32.vlgmr.msrb.gmra.mxu2 %v2433_v24  ;;  %v1479_v24 = vmul.f32 %v3107_v8, %v1478_v29  ;;  %v1512_v49 = vsel %vm3162_vm1, %v3086_v23, %v1508_v57  ;;  %v3173_v3 = vpop.eup %2023  ;;  %v1503_v37 = vsel %vm1500_vm7, %v1502_v55, %v1498_v39  ;;  %vm1483_vm8 = vmor %vm1481_vm6, %vm1482_vm5  ;;  %v3431_v39 = vld [vmem:[#allocation13_spill] sm:$0xff] }
 0x3ea   : > { %1576 = vmatpush.xpose.msra.mxu2 %v1575_v30  ;;  %2025 = vrcp.f32 %v3149_v50  ;;  %v1517_v23 = vsel %vm1514_vm3, %v1516_v56, %v1512_v49  ;;  %v1435_v20 = vmul.f32 %v3173_v3, %v3124_v18  ;;  %vm1468_vm9 = vweird.f32 %v3138_v4 }
 0x3eb   : > { %v1464_v33 = vsub.f32 1.0, %v1463_v10  ;;  %2027 = vrcp.f32 %v3167_v11  ;;  %v1480_v27 = vadd.f32 %v3107_v8, %v1479_v24  ;;  %v1572_v36 = vmul.f32 %v2748_v1, %v1517_v23 }
 0x3ec   : > { %v1436_v16 = vsub.f32 1.0, %v1435_v20  ;;  %v1488_v1 = vor.u32 1.1754944e-38, %v1487_v45  ;;  %v1473_v41 = vand.u32 2147483648, %v3100_v22  ;;  %vm1467_vm10 = vweird.f32 %v3100_v22  ;;  %v3434_v45 = vld [vmem:[#allocation14_spill] sm:$0xff] }
 0x3ed   : > { %v1465_v51 = vmul.f32 %v3138_v4, %v1464_v33  ;;  %v1484_v35 = vsel %vm1483_vm8, %v3107_v8, %v1480_v27  ;;  %v1571_v46 = vmul.f32 %v2688_v12, %v1503_v37  ;;  %vm1486_vm11 = vcmp.eq.f32.partialorder %v1485_v40, 8.507059e+37  ;;  %vm3213_vm12 = vmor %vm1467_vm10, %vm1468_vm9 }
 0x3ee   : > { %1577 = vmatpush.xpose.msra.mxu2 %v1574_v14  ;;  %v1471_v6 = vand.u32 2147483647, %v3100_v22  ;;  %v1489_v47 = vsel %vm1486_vm11, %v1488_v1, %v1484_v35  ;;  %v1452_v8 = vadd.f32 %v3096_v42, %v1451_v13  ;;  %vm1454_vm13 = vweird.f32 %v3096_v42 }
 0x3ef   : > { %v1437_v43 = vmul.f32 %v3173_v3, %v1436_v16  ;;  %vm1453_vm14 = vweird.f32 %v3057_v54  ;;  %v1459_v22 = vand.u32 2147483648, %v3057_v54  ;;  %v1474_v62 = vor.u32 1.1754944e-38, %v1473_v41 }
 0x3f0   : > { %v3194_v15 = vpop.eup %2025  ;;  %v1570_v7 = vmul.f32 %v2746_v21, %v1489_v47  ;;  %vm1472_vm15 = vcmp.eq.f32.partialorder %v1471_v6, 8.507059e+37  ;;  %vm3229_vm0 = vmor %vm1453_vm14, %vm1454_vm13  ;;  %v1457_v10 = vand.u32 2147483647, %v3057_v54  ;;  %vm1440_vm1 = vweird.f32 %v3173_v3 }
 0x3f1   : > { %1057 = vmatmul.f32.gmra.mxu2 %v2436_v26  ;;  %v1421_v34 = vmul.f32 %v3194_v15, %v3149_v50  ;;  %v1466_v26 = vadd.f32 %v3138_v4, %v1465_v51  ;;  %v3207_v25 = vpop.eup %2027  ;;  %v1460_v21 = vor.u32 1.1754944e-38, %v1459_v22  ;;  %v1445_v14 = vand.u32 2147483648, %v3124_v18  ;;  %v3432_v51 = vld [vmem:[#allocation24_spill] sm:$0xff] }
 0x3f2   : > { %1578 = vmatpush.xpose.msra.mxu2 %v1573_v48  ;;  %v1407_v52 = vmul.f32 %v3207_v25, %v3167_v11  ;;  %vm1439_vm2 = vweird.f32 %v3124_v18  ;;  %vm1458_vm3 = vcmp.eq.f32.partialorder %v1457_v10, 8.507059e+37  ;;  %v1443_v17 = vand.u32 2147483647, %v3124_v18 }
 0x3f3   : > { %v1422_v0 = vsub.f32 1.0, %v1421_v34  ;;  %v1470_v12 = vsel %vm3213_vm12, %v3138_v4, %v1466_v26  ;;  %v1456_v4 = vsel %vm3229_vm0, %v3096_v42, %v1452_v8  ;;  %vm1441_vm4 = vmor %vm1439_vm2, %vm1440_vm1  ;;  %vm1426_vm5 = vweird.f32 %v3194_v15 }
 0x3f4   : > { %v1475_v57 = vsel %vm1472_vm15, %v1474_v62, %v1470_v12  ;;  %v1408_v63 = vsub.f32 1.0, %v1407_v52  ;;  %v1461_v19 = vsel %vm1458_vm3, %v1460_v21, %v1456_v4  ;;  %v1446_v38 = vor.u32 1.1754944e-38, %v1445_v14 }
 0x3f5   : > { %v1423_v59 = vmul.f32 %v3194_v15, %v1422_v0  ;;  %v1569_v54 = vmul.f32 %v2757_v32, %v1475_v57  ;;  %v1431_v24 = vand.u32 2147483648, %v3149_v50  ;;  %vm1425_vm6 = vweird.f32 %v3149_v50  ;;  %v3429_v32 = vld [vmem:[#allocation21_spill] sm:$0xff] }
 0x3f6   : > { %1579 = vmatpush.xpose.msra.mxu2 %v1572_v36  ;;  %v1409_v42 = vmul.f32 %v3207_v25, %v1408_v63  ;;  %v1568_v18 = vmul.f32 %v3429_v32, %v1461_v19  ;;  %vm1444_vm7 = vcmp.eq.f32.partialorder %v1443_v17, 8.507059e+37  ;;  %v1429_v33 = vand.u32 2147483647, %v3149_v50  ;;  %vm1427_vm8 = vmor %vm1425_vm6, %vm1426_vm5  ;;  %v1311_v36 = vpop.xlane.xlu0 %1310 }
 0x3f7   : > { %v1424_v2 = vadd.f32 %v3194_v15, %v1423_v59  ;;  %vm1412_vm9 = vweird.f32 %v3207_v25  ;;  %v1417_v56 = vand.u32 2147483648, %v3167_v11  ;;  %v1432_v48 = vor.u32 1.1754944e-38, %v1431_v24 }
 0x3f8   : > { %v1410_v53 = vadd.f32 %v3207_v25, %v1409_v42  ;;  %vm1411_vm10 = vweird.f32 %v3167_v11  ;;  %vm1430_vm11 = vcmp.eq.f32.partialorder %v1429_v33, 8.507059e+37  ;;  %v1415_v44 = vand.u32 2147483647, %v3167_v11  ;;  %v1309_v11 = vpop.xlane.xlu1 %1308 }
 0x3f9   : > { %1060 = vmatmul.f32.gmra.mxu2 %v2439_v28  ;;  %v1438_v28 = vadd.f32 %v3173_v3, %v1437_v43  ;;  %vm1413_vm12 = vmor %vm1411_vm10, %vm1412_vm9  ;;  %v1418_v23 = vor.u32 1.1754944e-38, %v1417_v56  ;;  %2029 = vrcp.f32 %v1311_v36  ;;  %vm1383_vm0 = vweird.f32 %v1311_v36  ;;  %v3439_v56 = vld [vmem:[#allocation26_spill] sm:$0xff] }
 0x3fa   : > { %1580 = vmatpush.xpose.msra.mxu2 %v1571_v46  ;;  %v1414_v58 = vsel %vm1413_vm12, %v3207_v25, %v1410_v53  ;;  %vm1416_vm13 = vcmp.eq.f32.partialorder %v1415_v44, 8.507059e+37  ;;  %2031 = vrcp.f32 %v1309_v11  ;;  %v1389_v62 = vand.u32 2147483648, %v1311_v36 }
 0x3fb   : > { %v1442_v5 = vsel %vm1441_vm4, %v3173_v3, %v1438_v28  ;;  %v1428_v3 = vsel %vm1427_vm8, %v3194_v15, %v1424_v2  ;;  %v1419_v27 = vsel %vm1416_vm13, %v1418_v23, %v1414_v58  ;;  %v3433_v15 = vld [vmem:[#allocation22_spill] sm:$0xff]  ;;  %v1387_v10 = vand.u32 2147483647, %v1311_v36 }
 0x3fc   : > { %v1447_v49 = vsel %vm1444_vm7, %v1446_v38, %v1442_v5  ;;  %v1433_v50 = vsel %vm1430_vm11, %v1432_v48, %v1428_v3  ;;  %v1565_v55 = vmul.f32 %v3433_v15, %v1419_v27  ;;  %v1375_v17 = vand.u32 2147483648, %v1309_v11 }
 0x3fd   : > { %v1566_v20 = vmul.f32 %v3432_v51, %v1433_v50  ;;  %v1390_v19 = vor.u32 1.1754944e-38, %v1389_v62  ;;  %vm1369_vm6 = vweird.f32 %v1309_v11  ;;  %vm1388_vm7 = vcmp.eq.f32.partialorder %v1387_v10, 8.507059e+37 }
 0x3fe   : > { %1581 = vmatpush.xpose.msra.mxu2 %v1570_v7 }
 0x3ff   : > { %v2030_v40 = vpop.eup %2029 }
 0x400   : > { %v1379_v13 = vmul.f32 %v2030_v40, %v1311_v36  ;;  %v3265_v37 = vpop.eup %2031  ;;  %v3267_v16 = vpop.xlane.xlu0 %1304  ;;  %vm1384_vm14 = vweird.f32 %v2030_v40  ;;  %v3441_v36 = vld [vmem:[#allocation27_spill] sm:$0xff] }
 0x401   : > { %1063 = vmatmul.f32.gmra.mxu2 %v2443_v31  ;;  %v3430_v31 = vld [vmem:[#allocation23_spill] sm:$0xff]  ;;  %v1365_v35 = vmul.f32 %v3265_v37, %v1309_v11  ;;  %vm3276_vm2 = vmor %vm1383_vm0, %vm1384_vm14  ;;  %vm1370_vm3 = vweird.f32 %v3265_v37  ;;  %v1347_v50 = vand.u32 2147483648, %v3267_v16  ;;  %vm1341_vm14 = vweird.f32 %v3267_v16 }
 0x402   : > { %1582 = vmatpush.xpose.msra.mxu2 %v1569_v54  ;;  %v1567_v60 = vmul.f32 %v3430_v31, %v1447_v49  ;;  %v1380_v26 = vsub.f32 1.0, %v1379_v13  ;;  %v1373_v54 = vand.u32 2147483647, %v1309_v11  ;;  %vm3287_vm8 = vmor %vm1369_vm6, %vm1370_vm3  ;;  %v1376_v49 = vor.u32 1.1754944e-38, %v1375_v17  ;;  %v3443_v13 = vld [vmem:[#allocation16_spill] sm:$0xff] }
 0x403   : > { %v1366_v1 = vsub.f32 1.0, %v1365_v35  ;;  %v1345_v23 = vand.u32 2147483647, %v3267_v16  ;;  %v1348_v15 = vor.u32 1.1754944e-38, %v1347_v50  ;;  %v3446_v35 = vld [vmem:[#allocation19_spill] sm:$0xff] }
 0x404   : > { %v1381_v41 = vmul.f32 %v2030_v40, %v1380_v26  ;;  %vm1374_vm10 = vcmp.eq.f32.partialorder %v1373_v54, 8.507059e+37 }
 0x405   : > { %v1367_v8 = vmul.f32 %v3265_v37, %v1366_v1 }
 0x406   : > { %1583 = vmatpush.xpose.msra.mxu2 %v1568_v18  ;;  %v1382_v43 = vadd.f32 %v2030_v40, %v1381_v41 }
 0x407   : > { %v1368_v4 = vadd.f32 %v3265_v37, %v1367_v8 }
 0x408   : > { %v1386_v59 = vsel %vm3276_vm2, %v2030_v40, %v1382_v43  ;;  %v3442_v40 = vld [vmem:[#allocation15_spill] sm:$0xff] }
 0x409   : > { %1066 = vmatmul.f32.gmra.mxu2 %v3431_v39  ;;  %v1391_v24 = vsel %vm1388_vm7, %v1390_v19, %v1386_v59  ;;  %v1372_v33 = vsel %vm3287_vm8, %v3265_v37, %v1368_v4  ;;  %v3440_v39 = vld [vmem:[#allocation25_spill] sm:$0xff] }
 0x40a   : > { %1584 = vmatpush.xpose.msra.mxu2 %v1567_v60  ;;  %v1563_v48 = vmul.f32 %v3439_v56, %v1391_v24  ;;  %v1377_v31 = vsel %vm1374_vm10, %v1376_v49, %v1372_v33  ;;  %v3444_v37 = vld [vmem:[#allocation17_spill] sm:$0xff] }
 0x40b   : > { %v1562_v51 = vmul.f32 %v3440_v39, %v1377_v31 }
 0x40e   : > { %1585 = vmatpush.xpose.msra.mxu2 %v1566_v20 }
 0x411   : > { %1069 = vmatmul.f32.gmra.mxu2 %v3434_v45 }
 0x412   : > { %1586 = vmatpush.xpose.msra.mxu2 %v1565_v55 }
 0x430   : > { %v1313_v34 = vpop.xlane.xlu2 %1312 }
 0x431   : > { %2033 = vrcp.f32 %v1313_v34  ;;  %v1403_v52 = vand.u32 2147483648, %v1313_v34  ;;  %v1401_v22 = vand.u32 2147483647, %v1313_v34  ;;  %vm1397_vm1 = vweird.f32 %v1313_v34 }
 0x432   : > { %2035 = vrcp.f32 %v3267_v16 }
 0x433   : > { %v1404_v63 = vor.u32 1.1754944e-38, %v1403_v52  ;;  %vm1402_vm5 = vcmp.eq.f32.partialorder %v1401_v22, 8.507059e+37 }
 0x437   : > { %v2034_v25 = vpop.eup %2033 }
 0x438   : > { %v1393_v46 = vmul.f32 %v2034_v25, %v1313_v34  ;;  %v1307_v6 = vpop.xlane.xlu2 %1306  ;;  %v3271_v47 = vpop.eup %2035  ;;  %vm1398_vm15 = vweird.f32 %v2034_v25 }
 0x439   : > { %2037 = vrcp.f32 %v1307_v6  ;;  %v1337_v0 = vmul.f32 %v3271_v47, %v3267_v16  ;;  %vm1399_vm4 = vmor %vm1397_vm1, %vm1398_vm15  ;;  %vm1355_vm11 = vweird.f32 %v1307_v6  ;;  %v1359_v53 = vand.u32 2147483647, %v1307_v6 }
 0x43a   : > { %v1394_v30 = vsub.f32 1.0, %v1393_v46  ;;  %vm1342_vm13 = vweird.f32 %v3271_v47  ;;  %vm1346_vm1 = vcmp.eq.f32.partialorder %v1345_v23, 8.507059e+37 }
 0x43b   : > { %v1338_v28 = vsub.f32 1.0, %v1337_v0  ;;  %vm1360_vm15 = vcmp.eq.f32.partialorder %v1359_v53, 8.507059e+37  ;;  %vm1343_vm0 = vmor %vm1341_vm14, %vm1342_vm13 }
 0x43c   : > { %v1395_v12 = vmul.f32 %v2034_v25, %v1394_v30 }
 0x43d   : > { %v1339_v32 = vmul.f32 %v3271_v47, %v1338_v28 }
 0x43e   : > { %v1396_v7 = vadd.f32 %v2034_v25, %v1395_v12 }
 0x43f   : > { %v2038_v57 = vpop.eup %2037  ;;  %v1340_v60 = vadd.f32 %v3271_v47, %v1339_v32 }
 0x440   : > { %v1351_v21 = vmul.f32 %v2038_v57, %v1307_v6  ;;  %v1400_v14 = vsel %vm1399_vm4, %v2034_v25, %v1396_v7  ;;  %vm1356_vm9 = vweird.f32 %v2038_v57  ;;  %v3447_v25 = vld [vmem:[#allocation20_spill] sm:$0xff] }
 0x441   : > { %v1405_v42 = vsel %vm1402_vm5, %v1404_v63, %v1400_v14  ;;  %vm1357_vm12 = vmor %vm1355_vm11, %vm1356_vm9  ;;  %v1344_v27 = vsel %vm1343_vm0, %v3271_v47, %v1340_v60 }
 0x442   : > { %v1352_v5 = vsub.f32 1.0, %v1351_v21  ;;  %v1564_v2 = vmul.f32 %v2950_v61, %v1405_v42  ;;  %v1361_v61 = vand.u32 2147483648, %v1307_v6  ;;  %v1349_v45 = vsel %vm1346_vm1, %v1348_v15, %v1344_v27 }
 0x443   : > { %v1560_v11 = vmul.f32 %v3441_v36, %v1349_v45 }
 0x444   : > { %v1353_v18 = vmul.f32 %v2038_v57, %v1352_v5  ;;  %1587 = vmatpush.xpose.msra.mxu2 %v1564_v2  ;;  %v1362_v58 = vor.u32 1.1754944e-38, %v1361_v61 }
 0x446   : > { %v1354_v3 = vadd.f32 %v2038_v57, %v1353_v18 }
 0x448   : > { %1588 = vmatpush.xpose.msra.mxu2 %v1563_v48  ;;  %v1358_v44 = vsel %vm1357_vm12, %v2038_v57, %v1354_v3 }
 0x449   : > { %v1363_v20 = vsel %vm1360_vm15, %v1362_v58, %v1358_v44 }
 0x44a   : > { %v1561_v55 = vmul.f32 %v2990_v9, %v1363_v20  ;;  %v3445_v9 = vld [vmem:[#allocation18_spill] sm:$0xff] }
 0x44c   : > { %1589 = vmatpush.xpose.msra.mxu2 %v1562_v51 }
 0x450   : > { %1590 = vmatpush.xpose.msra.mxu2 %v1561_v55 }
 0x454   : > { %1591 = vmatpush.xpose.msra.mxu2 %v1560_v11 }
 0x457   : > { %1592 = vmatmul.f32.vlgmr.msra.gmra.mxu2 %v3442_v40 }
 0x45f   : > { %1595 = vmatmul.f32.gmra.mxu2 %v3443_v13 }
 0x467   : > { %1598 = vmatmul.f32.gmra.mxu2 %v3444_v37 }
 0x46c   : > { %v1055_v16 = vpop.f32.mrf.mxu2 }
 0x46d   : > { %1073 = vst [vmem:[%s3310_s4] sm:$0xff] %v1055_v16 }
 0x46f   : > { %1601 = vmatmul.f32.gmra.mxu2 %v3445_v9 }
 0x474   : > { %v1058_v34 = vpop.f32.mrf.mxu2 }
 0x475   : > { %1074 = vst [vmem:[%s3310_s4 + $0x8] sm:$0xff] %v1058_v34 }
 0x477   : > { %1604 = vmatmul.f32.gmra.mxu2 %v3446_v35 }
 0x47c   : > { %v1061_v26 = vpop.f32.mrf.mxu2 }
 0x47d   : > { %1075 = vst [vmem:[%s3310_s4 + $0x10] sm:$0xff] %v1061_v26 }
 0x47f   : > { %1607 = vmatmul.f32.gmra.mxu2 %v3447_v25 }
 0x484   : > { %v1064_v1 = vpop.f32.mrf.mxu2 }
 0x485   : > { %1076 = vst [vmem:[%s3310_s4 + $0x18] sm:$0xff] %v1064_v1 }
 0x48c   : > { %v1067_v41 = vpop.f32.mrf.mxu2 }
 0x48d   : > { %1077 = vst [vmem:[%s3310_s4 + $0x20] sm:$0xff] %v1067_v41 }
 0x494   : > { %v1070_v46 = vpop.f32.mrf.mxu2 }
 0x495   : > { %1078 = vst [vmem:[%s3310_s4 + $0x28] sm:$0xff] %v1070_v46 }
 0x4da   : > { %v1593_v6 = vpop.f32.mrf.mxu2 }
 0x4db   : > { %1611 = vst [vmem:[%s3310_s4 + $0x30] sm:$0xff] %v1593_v6 }
 0x4e2   : > { %v1596_v47 = vpop.f32.mrf.mxu2 }
 0x4e3   : > { %1612 = vst [vmem:[%s3310_s4 + $0x38] sm:$0xff] %v1596_v47 }
 0x4ea   : > { %v1599_v30 = vpop.f32.mrf.mxu2 }
 0x4eb   : > { %1613 = vst [vmem:[%s3310_s4 + $0x40] sm:$0xff] %v1599_v30 }
 0x4f2   : > { %v1602_v8 = vpop.f32.mrf.mxu2 }
 0x4f3   : > { %1614 = vst [vmem:[%s3310_s4 + $0x48] sm:$0xff] %v1602_v8 }
 0x4fa   : > { %v1605_v52 = vpop.f32.mrf.mxu2 }
 0x4fb   : > { %1615 = vst [vmem:[%s3310_s4 + $0x50] sm:$0xff] %v1605_v52 }
 0x502   : > { %v1608_v43 = vpop.f32.mrf.mxu2 }
 0x503   : > { %1616 = vst [vmem:[%s3310_s4 + $0x58] sm:$0xff] %v1608_v43 }
 0x504   : > { %2156 = shalt.err (!%p2153_p7)
}
 0x505   : > { %s2208_s18 = smov 128   ;;  %s2209_s6 = smov 8  }
 0x506   : > { %1852 = dma.vmem_to_hbm [thread:$0]  (%p2316_p11), %s1631_s27, 1536, %s1633_s28, %s1618_s5, %s2208_s18, %s2208_s18, %s2209_s6  }
 0x507 PF: > { %s1647_s10 = sand.u32 1, %s2191_s12   ;;  %p3448_p10 = scmp.ge.s32.totalorder %s2203_s15, 2 }
 0x508   : > { %s1648_s23 = scalar_lea.sflag [#allocation4], %s1647_s10 }
 0x509   : > { %p1866_p13 = pnand %p3448_p10, %p2320_p12 }
 0x50b   : > { %p1867_p0 = pneg %p1866_p13 }
 0x50d   : > { %2186 = dma.done.wait (%p1867_p0), %s1648_s23, 1536  }
 0x50e   : > { %2188 = vsyncadd (%p1867_p0), %s1648_s23, 4294965760  ;;  %p17_p4 = scmp.ge.s32.totalorder %s2251_s16, 4   ;;  %s3449_s12 = smov %s2195_s13 }
 0x50f   : > { %s3450_s13 = smov %s2199_s14  ;;  %s3451_s14 = smov %s2260_s19 }
 0x510   : > { %s3452_s15 = smov %s2251_s16  ;;  %19 = sbr.rel (!%p17_p4) target bundleno = 6 (0x6), region = 92 }
 0x515   :  { %1654 = vsyncpa [#allocation3], 1 }
 0x516   :  { %1656 = vsyncpa [#allocation3 + $0x1], 1 }
 0x517   :  { %1657 = vsyncpa [#allocation6], 1 }
 0x518   :  { %1658 = vsyncpa [#allocation4], 1 }
 0x519   :  { %1660 = vsyncpa [#allocation4 + $0x1], 1 }

</bundles_post_ra>
